<compile_context>
chip_gen: v7x
topology: tpu7x:2x2x1
jax: 0.10.0
libtpu: 0.0.40
codegen_flags: <defaults>
</compile_context>

<pallas_src>
import numpy as np
import jax
import jax.numpy as jnp
from jax.experimental import pallas as pl
from jax.experimental.pallas import tpu as pltpu


# ----------------------------- index maps ----------------------------------

def _plane_map(p):
    return (p, 0, 0)


def _const_map(p):
    return (0, 0)


# ------------------------- static upsample metadata -------------------------

def _nearest_idx(out_size, in_size):
    # PyTorch F.interpolate(mode='nearest'): src = floor(dst * in / out).
    # TODO(synk): PyTorch rounds through float32; this exact-integer form can
    # differ by one pixel for pathological non-integer ratios.
    return (np.arange(out_size) * in_size) // out_size


def _row_spans(hi, ho):
    """For each input row h: (first output row, count) it replicates into."""
    ri = _nearest_idx(ho, hi)
    spans = []
    for h in range(hi):
        hits = np.nonzero(ri == h)[0]
        spans.append((int(hits[0]), int(hits.size)) if hits.size else (0, 0))
    return tuple(spans)


def _col_selector(wi, wo, dtype):
    """(Wi, Wo) one-hot matrix so that row @ sel == nearest-upsampled row."""
    ci = _nearest_idx(wo, wi)
    sel = np.zeros((wi, wo), dtype=np.float32)
    sel[ci, np.arange(wo)] = 1.0
    return jnp.asarray(sel, dtype=dtype)


# ------------------------------ kernel body ---------------------------------

def _make_kernel(row_spans, skip_w_matmul):
    n_up = len(row_spans)

    def kernel(*refs):
        # refs = [x0, sel0, x1, sel1, ..., x_last, out, acc_scratch]
        out_ref = refs[-2]
        acc_ref = refs[-1]
        x_last_ref = refs[-3]

        acc_ref[...] = x_last_ref[...].astype(jnp.float32)          # (TB, Ho, Wo)
        for i in range(n_up):
            x_ref = refs[2 * i]                                      # (TB, Hi, Wi)
            sel_ref = refs[2 * i + 1]                                # (Wi, Wo)
            sel_w = None if skip_w_matmul[i] else sel_ref[...]
            for h, (start, count) in enumerate(row_spans[i]):
                if count == 0:                                       # downsample: row unused
                    continue
                row = x_ref[:, h, :]                                 # (TB, Wi)
                if skip_w_matmul[i]:
                    y = row.astype(jnp.float32)                      # Wi == Wo
                else:
                    y = jnp.dot(row, sel_w, preferred_element_type=jnp.float32)  # (TB, Wo)
                sl = slice(start, start + count)
                acc_ref[:, sl, :] = acc_ref[:, sl, :] + y[:, None, :]
        out_ref[...] = acc_ref[...].astype(out_ref.dtype)

    return kernel


# ------------------------- tiling / budget helpers ---------------------------

def _round_up(x, m):
    return ((x + m - 1) // m) * m


def _vmem_capacity_bytes():
    try:
        return int(pltpu.get_tpu_info().vmem_capacity_bytes)
    except Exception:
        return 64 << 20          # conservative (v7x-sized) fallback


def _num_tensorcores():
    try:
        kind = jax.devices()[0].device_kind.lower()
    except Exception:
        return 1
    return 2 if any(t in kind for t in ("v7", "v4")) else 1


def _pick_tb(b, per_tb_bytes, budget_bytes, num_tc):
    """Planes per grid step: a divisor of b, as large as the VMEM budget allows."""
    cap = max(1, budget_bytes // max(per_tb_bytes, 1))
    cap = min(cap, b, 1024)
    divisors = [d for d in range(1, cap + 1) if b % d == 0]
    tb = divisors[-1]
    if num_tc > 1:
        # Prefer an even (>=2) number of grid steps so the 'parallel' axis splits
        # across both TensorCores, unless it costs >2x in tile size.
        even = [d for d in divisors if (b // d) % 2 == 0]
        if even and even[-1] * 2 >= tb:
            tb = even[-1]
    return tb


# --------------------------------- wrapper -----------------------------------

def cbfuse(xs):
    """xs: list of NCHW arrays sharing N, C; the last entry sets the target HxW."""
    xs = list(xs)
    n, c, ho, wo = xs[-1].shape
    b = n * c
    dtype = xs[-1].dtype
    if not jnp.issubdtype(dtype, jnp.floating):
        # TODO(synk): integer inputs are computed in float32 (no universal int MXU path).
        dtype = jnp.float32
    xs = [x.astype(dtype) for x in xs]
    itemsize = jnp.dtype(dtype).itemsize
    if jnp.dtype(dtype) in (jnp.dtype(jnp.bfloat16), jnp.dtype(jnp.float16),
                            jnp.dtype(jnp.float32)):
        sel_dtype = dtype            # 0/1 selection is exact in these dtypes
    else:
        sel_dtype = jnp.float32
    sel_itemsize = jnp.dtype(sel_dtype).itemsize

    # --- VMEM footprint per TB plane (inputs/output double-buffered, acc single)
    out_tile = _round_up(ho, 8) * _round_up(wo, 128)
    per_tb = 0
    fixed = 0
    for x in xs[:-1]:
        hi, wi = x.shape[2], x.shape[3]
        per_tb += 2 * itemsize * _round_up(hi, 8) * _round_up(wi, 128)
        fixed += 2 * sel_itemsize * _round_up(wi, 8) * _round_up(wo, 128)
    per_tb += 2 * itemsize * out_tile        # last input
    per_tb += 2 * itemsize * out_tile        # output
    per_tb += 4 * out_tile                   # f32 accumulator scratch

    cap = _vmem_capacity_bytes()
    budget = min(int(cap * 0.5), 48 << 20)
    tb = _pick_tb(b, per_tb, max(budget - fixed, per_tb), _num_tensorcores())
    est_vmem = tb * per_tb + fixed
    vmem_limit = int(min(int(cap * 0.9), max(est_vmem + (8 << 20), 32 << 20)))

    grid = (b // tb,)   # tb always divides b

    # --- build inputs, specs and static upsample metadata
    inputs, in_specs, row_spans, skip_w = [], [], [], []
    flops = 0
    bytes_accessed = 0
    for x in xs[:-1]:
        hi, wi = x.shape[2], x.shape[3]
        row_spans.append(_row_spans(hi, ho))
        skip_w.append(wi == wo)
        sel = _col_selector(wi, wo, sel_dtype)
        inputs += [x.reshape(b, hi, wi), sel]
        in_specs += [
            pl.BlockSpec((tb, hi, wi), _plane_map),
            pl.BlockSpec((wi, wo), _const_map),   # constant index -> fetched once
        ]
        if wi != wo:
            flops += 2 * b * hi * wi * wo         # per-row W-upsample matmuls
        flops += b * ho * wo                      # broadcast-adds into accumulator
        bytes_accessed += b * hi * wi * itemsize + wi * wo * sel_itemsize
    inputs.append(xs[-1].reshape(b, ho, wo))
    in_specs.append(pl.BlockSpec((tb, ho, wo), _plane_map))
    bytes_accessed += 2 * b * ho * wo * itemsize  # last input + output

    out = pl.pallas_call(
        _make_kernel(tuple(row_spans), tuple(skip_w)),
        out_shape=jax.ShapeDtypeStruct((b, ho, wo), dtype),
        grid=grid,
        in_specs=in_specs,
        out_specs=pl.BlockSpec((tb, ho, wo), _plane_map),
        scratch_shapes=[pltpu.VMEM((tb, ho, wo), jnp.float32)],
        compiler_params=pltpu.CompilerParams(
            dimension_semantics=("parallel",),
            vmem_limit_bytes=vmem_limit),
        cost_estimate=pl.CostEstimate(
            flops=int(flops), transcendentals=0, bytes_accessed=int(bytes_accessed)),
    )(*inputs)
    return out.reshape(n, c, ho, wo)


# ------------------------------ pure-JAX reference ---------------------------

def cbfuse_ref(xs):
    ho, wo = xs[-1].shape[2:]
    acc = xs[-1]
    for x in xs[:-1]:
        hi, wi = x.shape[2:]
        ri = (jnp.arange(ho) * hi) // ho
        ci = (jnp.arange(wo) * wi) // wo
        acc = acc + x[:, :, ri, :][:, :, :, ci]
    return acc


if __name__ == "__main__":
    key = jax.random.PRNGKey(0)
    k0, k1, k2 = jax.random.split(key, 3)
    # Small multi-scale feature pyramid: N=2, C=4, spatial 4 / 8 / 16.
    xs = [
        jax.random.normal(k0, (2, 4, 4, 4), dtype=jnp.float32),
        jax.random.normal(k1, (2, 4, 8, 8), dtype=jnp.float32),
        jax.random.normal(k2, (2, 4, 16, 16), dtype=jnp.float32),
    ]

    out = jax.block_until_ready(cbfuse(xs))
    ref = cbfuse_ref(xs)
    assert out.shape == ref.shape == (2, 4, 16, 16)
    assert jnp.allclose(out, ref, atol=1e-5, rtol=1e-5)
    print("KERNEL_OK")
</pallas_src>

<mosaic_0001>
module attributes {stable_mosaic.version = 11 : i64} {
  func.func @kernel(%arg0: i32, %arg1: memref<8x4x4xf32, #tpu.memory_space<vmem>>, %arg2: memref<4x16xf32, #tpu.memory_space<vmem>>, %arg3: memref<8x8x8xf32, #tpu.memory_space<vmem>>, %arg4: memref<8x16xf32, #tpu.memory_space<vmem>>, %arg5: memref<8x16x16xf32, #tpu.memory_space<vmem>>, %arg6: memref<8x16x16xf32, #tpu.memory_space<vmem>>, %arg7: memref<8x16x16xf32, #tpu.memory_space<vmem>>) attributes {dimension_semantics = [#tpu.dimension_semantics<parallel>], iteration_bounds = array<i64: 1>, scalar_prefetch = 0 : i64, scratch_operands = 1 : i64, tpu.core_type = #tpu.core_type<tc>, window_params = [{transform_indices = @transform_0, window_bounds = array<i64: 8, 4, 4>}, {pipeline_mode = #tpu.pipeline_mode<synchronous>, transform_indices = @transform_1, window_bounds = array<i64: 4, 16>}, {transform_indices = @transform_2, window_bounds = array<i64: 8, 8, 8>}, {pipeline_mode = #tpu.pipeline_mode<synchronous>, transform_indices = @transform_3, window_bounds = array<i64: 8, 16>}, {transform_indices = @transform_4, window_bounds = array<i64: 8, 16, 16>}, {transform_indices = @transform_5, window_bounds = array<i64: 8, 16, 16>}]} {
    %c0 = arith.constant 0 : index
    %c0_0 = arith.constant 0 : index
    %c0_1 = arith.constant 0 : index
    %0 = vector.load %arg5[%c0, %c0_0, %c0_1] : memref<8x16x16xf32, #tpu.memory_space<vmem>>, vector<8x16x16xf32>
    %c0_2 = arith.constant 0 : index
    %c0_3 = arith.constant 0 : index
    %c0_4 = arith.constant 0 : index
    %1 = vector.load %arg7[%c0_2, %c0_3, %c0_4] : memref<8x16x16xf32, #tpu.memory_space<vmem>>, vector<8x16x16xf32>
    tpu.vector_store %arg7[%c0_2, %c0_3, %c0_4], %0 {strides = array<i32>} : memref<8x16x16xf32, #tpu.memory_space<vmem>>, vector<8x16x16xf32>,
    %c0_5 = arith.constant 0 : index
    %c0_6 = arith.constant 0 : index
    %2 = vector.load %arg2[%c0_5, %c0_6] : memref<4x16xf32, #tpu.memory_space<vmem>>, vector<4x16xf32>
    %c0_7 = arith.constant 0 : index
    %c0_8 = arith.constant 0 : index
    %c0_9 = arith.constant 0 : index
    %3 = vector.load %arg1[%c0_7, %c0_8, %c0_9] : memref<8x4x4xf32, #tpu.memory_space<vmem>>, vector<8x1x4xf32>
    %4 = vector.shape_cast %3 : vector<8x1x4xf32> to vector<8x4xf32>
    %cst = arith.constant dense<0.000000e+00> : vector<8x16xf32>
    %5 = tpu.matmul %4, %2, %cst {dimension_numbers = #tpu.dot_dimension_numbers<[1], [0], [0], [1], [0, 0, 1, 1], [], []>} : vector<8x4xf32>, vector<4x16xf32>, vector<8x16xf32> -> vector<8x16xf32>
    %c0_10 = arith.constant 0 : index
    %c0_11 = arith.constant 0 : index
    %c0_12 = arith.constant 0 : index
    %6 = vector.load %arg7[%c0_10, %c0_11, %c0_12] : memref<8x16x16xf32, #tpu.memory_space<vmem>>, vector<8x4x16xf32>
    %7 = vector.shape_cast %5 : vector<8x16xf32> to vector<8x1x16xf32>
    %8 = vector.broadcast %7 : vector<8x1x16xf32> to vector<8x4x16xf32>
    %9 = arith.addf %6, %8 : vector<8x4x16xf32>
    %c0_13 = arith.constant 0 : index
    %c0_14 = arith.constant 0 : index
    %c0_15 = arith.constant 0 : index
    %10 = vector.load %arg7[%c0_13, %c0_14, %c0_15] : memref<8x16x16xf32, #tpu.memory_space<vmem>>, vector<8x4x16xf32>
    tpu.vector_store %arg7[%c0_13, %c0_14, %c0_15], %9 {strides = array<i32>} : memref<8x16x16xf32, #tpu.memory_space<vmem>>, vector<8x4x16xf32>,
    %c0_16 = arith.constant 0 : index
    %c1 = arith.constant 1 : index
    %c0_17 = arith.constant 0 : index
    %11 = vector.load %arg1[%c0_16, %c1, %c0_17] : memref<8x4x4xf32, #tpu.memory_space<vmem>>, vector<8x1x4xf32>
    %12 = vector.shape_cast %11 : vector<8x1x4xf32> to vector<8x4xf32>
    %cst_18 = arith.constant dense<0.000000e+00> : vector<8x16xf32>
    %13 = tpu.matmul %12, %2, %cst_18 {dimension_numbers = #tpu.dot_dimension_numbers<[1], [0], [0], [1], [0, 0, 1, 1], [], []>} : vector<8x4xf32>, vector<4x16xf32>, vector<8x16xf32> -> vector<8x16xf32>
    %c0_19 = arith.constant 0 : index
    %c4 = arith.constant 4 : index
    %c0_20 = arith.constant 0 : index
    %14 = vector.load %arg7[%c0_19, %c4, %c0_20] : memref<8x16x16xf32, #tpu.memory_space<vmem>>, vector<8x4x16xf32>
    %15 = vector.shape_cast %13 : vector<8x16xf32> to vector<8x1x16xf32>
    %16 = vector.broadcast %15 : vector<8x1x16xf32> to vector<8x4x16xf32>
    %17 = arith.addf %14, %16 : vector<8x4x16xf32>
    %c0_21 = arith.constant 0 : index
    %c4_22 = arith.constant 4 : index
    %c0_23 = arith.constant 0 : index
    %18 = vector.load %arg7[%c0_21, %c4_22, %c0_23] : memref<8x16x16xf32, #tpu.memory_space<vmem>>, vector<8x4x16xf32>
    tpu.vector_store %arg7[%c0_21, %c4_22, %c0_23], %17 {strides = array<i32>} : memref<8x16x16xf32, #tpu.memory_space<vmem>>, vector<8x4x16xf32>,
    %c0_24 = arith.constant 0 : index
    %c2 = arith.constant 2 : index
    %c0_25 = arith.constant 0 : index
    %19 = vector.load %arg1[%c0_24, %c2, %c0_25] : memref<8x4x4xf32, #tpu.memory_space<vmem>>, vector<8x1x4xf32>
    %20 = vector.shape_cast %19 : vector<8x1x4xf32> to vector<8x4xf32>
    %cst_26 = arith.constant dense<0.000000e+00> : vector<8x16xf32>
    %21 = tpu.matmul %20, %2, %cst_26 {dimension_numbers = #tpu.dot_dimension_numbers<[1], [0], [0], [1], [0, 0, 1, 1], [], []>} : vector<8x4xf32>, vector<4x16xf32>, vector<8x16xf32> -> vector<8x16xf32>
    %c0_27 = arith.constant 0 : index
    %c8 = arith.constant 8 : index
    %c0_28 = arith.constant 0 : index
    %22 = vector.load %arg7[%c0_27, %c8, %c0_28] : memref<8x16x16xf32, #tpu.memory_space<vmem>>, vector<8x4x16xf32>
    %23 = vector.shape_cast %21 : vector<8x16xf32> to vector<8x1x16xf32>
    %24 = vector.broadcast %23 : vector<8x1x16xf32> to vector<8x4x16xf32>
    %25 = arith.addf %22, %24 : vector<8x4x16xf32>
    %c0_29 = arith.constant 0 : index
    %c8_30 = arith.constant 8 : index
    %c0_31 = arith.constant 0 : index
    %26 = vector.load %arg7[%c0_29, %c8_30, %c0_31] : memref<8x16x16xf32, #tpu.memory_space<vmem>>, vector<8x4x16xf32>
    tpu.vector_store %arg7[%c0_29, %c8_30, %c0_31], %25 {strides = array<i32>} : memref<8x16x16xf32, #tpu.memory_space<vmem>>, vector<8x4x16xf32>,
    %c0_32 = arith.constant 0 : index
    %c3 = arith.constant 3 : index
    %c0_33 = arith.constant 0 : index
    %27 = vector.load %arg1[%c0_32, %c3, %c0_33] : memref<8x4x4xf32, #tpu.memory_space<vmem>>, vector<8x1x4xf32>
    %28 = vector.shape_cast %27 : vector<8x1x4xf32> to vector<8x4xf32>
    %cst_34 = arith.constant dense<0.000000e+00> : vector<8x16xf32>
    %29 = tpu.matmul %28, %2, %cst_34 {dimension_numbers = #tpu.dot_dimension_numbers<[1], [0], [0], [1], [0, 0, 1, 1], [], []>} : vector<8x4xf32>, vector<4x16xf32>, vector<8x16xf32> -> vector<8x16xf32>
    %c0_35 = arith.constant 0 : index
    %c12 = arith.constant 12 : index
    %c0_36 = arith.constant 0 : index
    %30 = vector.load %arg7[%c0_35, %c12, %c0_36] : memref<8x16x16xf32, #tpu.memory_space<vmem>>, vector<8x4x16xf32>
    %31 = vector.shape_cast %29 : vector<8x16xf32> to vector<8x1x16xf32>
    %32 = vector.broadcast %31 : vector<8x1x16xf32> to vector<8x4x16xf32>
    %33 = arith.addf %30, %32 : vector<8x4x16xf32>
    %c0_37 = arith.constant 0 : index
    %c12_38 = arith.constant 12 : index
    %c0_39 = arith.constant 0 : index
    %34 = vector.load %arg7[%c0_37, %c12_38, %c0_39] : memref<8x16x16xf32, #tpu.memory_space<vmem>>, vector<8x4x16xf32>
    tpu.vector_store %arg7[%c0_37, %c12_38, %c0_39], %33 {strides = array<i32>} : memref<8x16x16xf32, #tpu.memory_space<vmem>>, vector<8x4x16xf32>,
    %c0_40 = arith.constant 0 : index
    %c0_41 = arith.constant 0 : index
    %35 = vector.load %arg4[%c0_40, %c0_41] : memref<8x16xf32, #tpu.memory_space<vmem>>, vector<8x16xf32>
    %c0_42 = arith.constant 0 : index
    %c0_43 = arith.constant 0 : index
    %c0_44 = arith.constant 0 : index
    %36 = vector.load %arg3[%c0_42, %c0_43, %c0_44] : memref<8x8x8xf32, #tpu.memory_space<vmem>>, vector<8x1x8xf32>
    %37 = vector.shape_cast %36 : vector<8x1x8xf32> to vector<8x8xf32>
    %cst_45 = arith.constant dense<0.000000e+00> : vector<8x16xf32>
    %38 = tpu.matmul %37, %35, %cst_45 {dimension_numbers = #tpu.dot_dimension_numbers<[1], [0], [0], [1], [0, 0, 1, 1], [], []>} : vector<8x8xf32>, vector<8x16xf32>, vector<8x16xf32> -> vector<8x16xf32>
    %c0_46 = arith.constant 0 : index
    %c0_47 = arith.constant 0 : index
    %c0_48 = arith.constant 0 : index
    %39 = vector.load %arg7[%c0_46, %c0_47, %c0_48] : memref<8x16x16xf32, #tpu.memory_space<vmem>>, vector<8x2x16xf32>
    %40 = vector.shape_cast %38 : vector<8x16xf32> to vector<8x1x16xf32>
    %41 = vector.broadcast %40 : vector<8x1x16xf32> to vector<8x2x16xf32>
    %42 = arith.addf %39, %41 : vector<8x2x16xf32>
    %c0_49 = arith.constant 0 : index
    %c0_50 = arith.constant 0 : index
    %c0_51 = arith.constant 0 : index
    %43 = vector.load %arg7[%c0_49, %c0_50, %c0_51] : memref<8x16x16xf32, #tpu.memory_space<vmem>>, vector<8x2x16xf32>
    tpu.vector_store %arg7[%c0_49, %c0_50, %c0_51], %42 {strides = array<i32>} : memref<8x16x16xf32, #tpu.memory_space<vmem>>, vector<8x2x16xf32>,
    %c0_52 = arith.constant 0 : index
    %c1_53 = arith.constant 1 : index
    %c0_54 = arith.constant 0 : index
    %44 = vector.load %arg3[%c0_52, %c1_53, %c0_54] : memref<8x8x8xf32, #tpu.memory_space<vmem>>, vector<8x1x8xf32>
    %45 = vector.shape_cast %44 : vector<8x1x8xf32> to vector<8x8xf32>
    %cst_55 = arith.constant dense<0.000000e+00> : vector<8x16xf32>
    %46 = tpu.matmul %45, %35, %cst_55 {dimension_numbers = #tpu.dot_dimension_numbers<[1], [0], [0], [1], [0, 0, 1, 1], [], []>} : vector<8x8xf32>, vector<8x16xf32>, vector<8x16xf32> -> vector<8x16xf32>
    %c0_56 = arith.constant 0 : index
    %c2_57 = arith.constant 2 : index
    %c0_58 = arith.constant 0 : index
    %47 = vector.load %arg7[%c0_56, %c2_57, %c0_58] : memref<8x16x16xf32, #tpu.memory_space<vmem>>, vector<8x2x16xf32>
    %48 = vector.shape_cast %46 : vector<8x16xf32> to vector<8x1x16xf32>
    %49 = vector.broadcast %48 : vector<8x1x16xf32> to vector<8x2x16xf32>
    %50 = arith.addf %47, %49 : vector<8x2x16xf32>
    %c0_59 = arith.constant 0 : index
    %c2_60 = arith.constant 2 : index
    %c0_61 = arith.constant 0 : index
    %51 = vector.load %arg7[%c0_59, %c2_60, %c0_61] : memref<8x16x16xf32, #tpu.memory_space<vmem>>, vector<8x2x16xf32>
    tpu.vector_store %arg7[%c0_59, %c2_60, %c0_61], %50 {strides = array<i32>} : memref<8x16x16xf32, #tpu.memory_space<vmem>>, vector<8x2x16xf32>,
    %c0_62 = arith.constant 0 : index
    %c2_63 = arith.constant 2 : index
    %c0_64 = arith.constant 0 : index
    %52 = vector.load %arg3[%c0_62, %c2_63, %c0_64] : memref<8x8x8xf32, #tpu.memory_space<vmem>>, vector<8x1x8xf32>
    %53 = vector.shape_cast %52 : vector<8x1x8xf32> to vector<8x8xf32>
    %cst_65 = arith.constant dense<0.000000e+00> : vector<8x16xf32>
    %54 = tpu.matmul %53, %35, %cst_65 {dimension_numbers = #tpu.dot_dimension_numbers<[1], [0], [0], [1], [0, 0, 1, 1], [], []>} : vector<8x8xf32>, vector<8x16xf32>, vector<8x16xf32> -> vector<8x16xf32>
    %c0_66 = arith.constant 0 : index
    %c4_67 = arith.constant 4 : index
    %c0_68 = arith.constant 0 : index
    %55 = vector.load %arg7[%c0_66, %c4_67, %c0_68] : memref<8x16x16xf32, #tpu.memory_space<vmem>>, vector<8x2x16xf32>
    %56 = vector.shape_cast %54 : vector<8x16xf32> to vector<8x1x16xf32>
    %57 = vector.broadcast %56 : vector<8x1x16xf32> to vector<8x2x16xf32>
    %58 = arith.addf %55, %57 : vector<8x2x16xf32>
    %c0_69 = arith.constant 0 : index
    %c4_70 = arith.constant 4 : index
    %c0_71 = arith.constant 0 : index
    %59 = vector.load %arg7[%c0_69, %c4_70, %c0_71] : memref<8x16x16xf32, #tpu.memory_space<vmem>>, vector<8x2x16xf32>
    tpu.vector_store %arg7[%c0_69, %c4_70, %c0_71], %58 {strides = array<i32>} : memref<8x16x16xf32, #tpu.memory_space<vmem>>, vector<8x2x16xf32>,
    %c0_72 = arith.constant 0 : index
    %c3_73 = arith.constant 3 : index
    %c0_74 = arith.constant 0 : index
    %60 = vector.load %arg3[%c0_72, %c3_73, %c0_74] : memref<8x8x8xf32, #tpu.memory_space<vmem>>, vector<8x1x8xf32>
    %61 = vector.shape_cast %60 : vector<8x1x8xf32> to vector<8x8xf32>
    %cst_75 = arith.constant dense<0.000000e+00> : vector<8x16xf32>
    %62 = tpu.matmul %61, %35, %cst_75 {dimension_numbers = #tpu.dot_dimension_numbers<[1], [0], [0], [1], [0, 0, 1, 1], [], []>} : vector<8x8xf32>, vector<8x16xf32>, vector<8x16xf32> -> vector<8x16xf32>
    %c0_76 = arith.constant 0 : index
    %c6 = arith.constant 6 : index
    %c0_77 = arith.constant 0 : index
    %63 = vector.load %arg7[%c0_76, %c6, %c0_77] : memref<8x16x16xf32, #tpu.memory_space<vmem>>, vector<8x2x16xf32>
    %64 = vector.shape_cast %62 : vector<8x16xf32> to vector<8x1x16xf32>
    %65 = vector.broadcast %64 : vector<8x1x16xf32> to vector<8x2x16xf32>
    %66 = arith.addf %63, %65 : vector<8x2x16xf32>
    %c0_78 = arith.constant 0 : index
    %c6_79 = arith.constant 6 : index
    %c0_80 = arith.constant 0 : index
    %67 = vector.load %arg7[%c0_78, %c6_79, %c0_80] : memref<8x16x16xf32, #tpu.memory_space<vmem>>, vector<8x2x16xf32>
    tpu.vector_store %arg7[%c0_78, %c6_79, %c0_80], %66 {strides = array<i32>} : memref<8x16x16xf32, #tpu.memory_space<vmem>>, vector<8x2x16xf32>,
    %c0_81 = arith.constant 0 : index
    %c4_82 = arith.constant 4 : index
    %c0_83 = arith.constant 0 : index
    %68 = vector.load %arg3[%c0_81, %c4_82, %c0_83] : memref<8x8x8xf32, #tpu.memory_space<vmem>>, vector<8x1x8xf32>
    %69 = vector.shape_cast %68 : vector<8x1x8xf32> to vector<8x8xf32>
    %cst_84 = arith.constant dense<0.000000e+00> : vector<8x16xf32>
    %70 = tpu.matmul %69, %35, %cst_84 {dimension_numbers = #tpu.dot_dimension_numbers<[1], [0], [0], [1], [0, 0, 1, 1], [], []>} : vector<8x8xf32>, vector<8x16xf32>, vector<8x16xf32> -> vector<8x16xf32>
    %c0_85 = arith.constant 0 : index
    %c8_86 = arith.constant 8 : index
    %c0_87 = arith.constant 0 : index
    %71 = vector.load %arg7[%c0_85, %c8_86, %c0_87] : memref<8x16x16xf32, #tpu.memory_space<vmem>>, vector<8x2x16xf32>
    %72 = vector.shape_cast %70 : vector<8x16xf32> to vector<8x1x16xf32>
    %73 = vector.broadcast %72 : vector<8x1x16xf32> to vector<8x2x16xf32>
    %74 = arith.addf %71, %73 : vector<8x2x16xf32>
    %c0_88 = arith.constant 0 : index
    %c8_89 = arith.constant 8 : index
    %c0_90 = arith.constant 0 : index
    %75 = vector.load %arg7[%c0_88, %c8_89, %c0_90] : memref<8x16x16xf32, #tpu.memory_space<vmem>>, vector<8x2x16xf32>
    tpu.vector_store %arg7[%c0_88, %c8_89, %c0_90], %74 {strides = array<i32>} : memref<8x16x16xf32, #tpu.memory_space<vmem>>, vector<8x2x16xf32>,
    %c0_91 = arith.constant 0 : index
    %c5 = arith.constant 5 : index
    %c0_92 = arith.constant 0 : index
    %76 = vector.load %arg3[%c0_91, %c5, %c0_92] : memref<8x8x8xf32, #tpu.memory_space<vmem>>, vector<8x1x8xf32>
    %77 = vector.shape_cast %76 : vector<8x1x8xf32> to vector<8x8xf32>
    %cst_93 = arith.constant dense<0.000000e+00> : vector<8x16xf32>
    %78 = tpu.matmul %77, %35, %cst_93 {dimension_numbers = #tpu.dot_dimension_numbers<[1], [0], [0], [1], [0, 0, 1, 1], [], []>} : vector<8x8xf32>, vector<8x16xf32>, vector<8x16xf32> -> vector<8x16xf32>
    %c0_94 = arith.constant 0 : index
    %c10 = arith.constant 10 : index
    %c0_95 = arith.constant 0 : index
    %79 = vector.load %arg7[%c0_94, %c10, %c0_95] : memref<8x16x16xf32, #tpu.memory_space<vmem>>, vector<8x2x16xf32>
    %80 = vector.shape_cast %78 : vector<8x16xf32> to vector<8x1x16xf32>
    %81 = vector.broadcast %80 : vector<8x1x16xf32> to vector<8x2x16xf32>
    %82 = arith.addf %79, %81 : vector<8x2x16xf32>
    %c0_96 = arith.constant 0 : index
    %c10_97 = arith.constant 10 : index
    %c0_98 = arith.constant 0 : index
    %83 = vector.load %arg7[%c0_96, %c10_97, %c0_98] : memref<8x16x16xf32, #tpu.memory_space<vmem>>, vector<8x2x16xf32>
    tpu.vector_store %arg7[%c0_96, %c10_97, %c0_98], %82 {strides = array<i32>} : memref<8x16x16xf32, #tpu.memory_space<vmem>>, vector<8x2x16xf32>,
    %c0_99 = arith.constant 0 : index
    %c6_100 = arith.constant 6 : index
    %c0_101 = arith.constant 0 : index
    %84 = vector.load %arg3[%c0_99, %c6_100, %c0_101] : memref<8x8x8xf32, #tpu.memory_space<vmem>>, vector<8x1x8xf32>
    %85 = vector.shape_cast %84 : vector<8x1x8xf32> to vector<8x8xf32>
    %cst_102 = arith.constant dense<0.000000e+00> : vector<8x16xf32>
    %86 = tpu.matmul %85, %35, %cst_102 {dimension_numbers = #tpu.dot_dimension_numbers<[1], [0], [0], [1], [0, 0, 1, 1], [], []>} : vector<8x8xf32>, vector<8x16xf32>, vector<8x16xf32> -> vector<8x16xf32>
    %c0_103 = arith.constant 0 : index
    %c12_104 = arith.constant 12 : index
    %c0_105 = arith.constant 0 : index
    %87 = vector.load %arg7[%c0_103, %c12_104, %c0_105] : memref<8x16x16xf32, #tpu.memory_space<vmem>>, vector<8x2x16xf32>
    %88 = vector.shape_cast %86 : vector<8x16xf32> to vector<8x1x16xf32>
    %89 = vector.broadcast %88 : vector<8x1x16xf32> to vector<8x2x16xf32>
    %90 = arith.addf %87, %89 : vector<8x2x16xf32>
    %c0_106 = arith.constant 0 : index
    %c12_107 = arith.constant 12 : index
    %c0_108 = arith.constant 0 : index
    %91 = vector.load %arg7[%c0_106, %c12_107, %c0_108] : memref<8x16x16xf32, #tpu.memory_space<vmem>>, vector<8x2x16xf32>
    tpu.vector_store %arg7[%c0_106, %c12_107, %c0_108], %90 {strides = array<i32>} : memref<8x16x16xf32, #tpu.memory_space<vmem>>, vector<8x2x16xf32>,
    %c0_109 = arith.constant 0 : index
    %c7 = arith.constant 7 : index
    %c0_110 = arith.constant 0 : index
    %92 = vector.load %arg3[%c0_109, %c7, %c0_110] : memref<8x8x8xf32, #tpu.memory_space<vmem>>, vector<8x1x8xf32>
    %93 = vector.shape_cast %92 : vector<8x1x8xf32> to vector<8x8xf32>
    %cst_111 = arith.constant dense<0.000000e+00> : vector<8x16xf32>
    %94 = tpu.matmul %93, %35, %cst_111 {dimension_numbers = #tpu.dot_dimension_numbers<[1], [0], [0], [1], [0, 0, 1, 1], [], []>} : vector<8x8xf32>, vector<8x16xf32>, vector<8x16xf32> -> vector<8x16xf32>
    %c0_112 = arith.constant 0 : index
    %c14 = arith.constant 14 : index
    %c0_113 = arith.constant 0 : index
    %95 = vector.load %arg7[%c0_112, %c14, %c0_113] : memref<8x16x16xf32, #tpu.memory_space<vmem>>, vector<8x2x16xf32>
    %96 = vector.shape_cast %94 : vector<8x16xf32> to vector<8x1x16xf32>
    %97 = vector.broadcast %96 : vector<8x1x16xf32> to vector<8x2x16xf32>
    %98 = arith.addf %95, %97 : vector<8x2x16xf32>
    %c0_114 = arith.constant 0 : index
    %c14_115 = arith.constant 14 : index
    %c0_116 = arith.constant 0 : index
    %99 = vector.load %arg7[%c0_114, %c14_115, %c0_116] : memref<8x16x16xf32, #tpu.memory_space<vmem>>, vector<8x2x16xf32>
    tpu.vector_store %arg7[%c0_114, %c14_115, %c0_116], %98 {strides = array<i32>} : memref<8x16x16xf32, #tpu.memory_space<vmem>>, vector<8x2x16xf32>,
    %c0_117 = arith.constant 0 : index
    %c0_118 = arith.constant 0 : index
    %c0_119 = arith.constant 0 : index
    %100 = vector.load %arg7[%c0_117, %c0_118, %c0_119] : memref<8x16x16xf32, #tpu.memory_space<vmem>>, vector<8x16x16xf32>
    %c0_120 = arith.constant 0 : index
    %c0_121 = arith.constant 0 : index
    %c0_122 = arith.constant 0 : index
    %101 = vector.load %arg6[%c0_120, %c0_121, %c0_122] : memref<8x16x16xf32, #tpu.memory_space<vmem>>, vector<8x16x16xf32>
    tpu.vector_store %arg6[%c0_120, %c0_121, %c0_122], %100 {strides = array<i32>} : memref<8x16x16xf32, #tpu.memory_space<vmem>>, vector<8x16x16xf32>,
    return
  }
  func.func @transform_0(%arg0: i32) -> (i32, i32, i32) {
    %c0_i32 = arith.constant 0 : i32
    %c0_i32_0 = arith.constant 0 : i32
    %c0_i32_1 = arith.constant 0 : i32
    return %arg0, %c0_i32, %c0_i32_0 : i32, i32, i32
  }
  func.func @transform_1(%arg0: i32) -> (i32, i32) {
    %c0_i32 = arith.constant 0 : i32
    %c0_i32_0 = arith.constant 0 : i32
    %c0_i32_1 = arith.constant 0 : i32
    return %c0_i32, %c0_i32_0 : i32, i32
  }
  func.func @transform_2(%arg0: i32) -> (i32, i32, i32) {
    %c0_i32 = arith.constant 0 : i32
    %c0_i32_0 = arith.constant 0 : i32
    %c0_i32_1 = arith.constant 0 : i32
    return %arg0, %c0_i32, %c0_i32_0 : i32, i32, i32
  }
  func.func @transform_3(%arg0: i32) -> (i32, i32) {
    %c0_i32 = arith.constant 0 : i32
    %c0_i32_0 = arith.constant 0 : i32
    %c0_i32_1 = arith.constant 0 : i32
    return %c0_i32, %c0_i32_0 : i32, i32
  }
  func.func @transform_4(%arg0: i32) -> (i32, i32, i32) {
    %c0_i32 = arith.constant 0 : i32
    %c0_i32_0 = arith.constant 0 : i32
    %c0_i32_1 = arith.constant 0 : i32
    return %arg0, %c0_i32, %c0_i32_0 : i32, i32, i32
  }
  func.func @transform_5(%arg0: i32) -> (i32, i32, i32) {
    %c0_i32 = arith.constant 0 : i32
    %c0_i32_0 = arith.constant 0 : i32
    %c0_i32_1 = arith.constant 0 : i32
    return %arg0, %c0_i32, %c0_i32_0 : i32, i32, i32
  }
}

</mosaic_0001>

<bundles_post_ra>
// kernel: tpu_custom_call.1
= control target key start
LH: loop header
LB: loop body
LE: loop exit
PB: predicated region body
PF: predicated region fallthrough
CT: control target
= control target key end

     0   :  { %10 = vsyncpa [#allocation4], 0  ;;  %s3624_s0 = inlined_call_operand.vmem [shape: f32[8,4,4], index: 0, kind: input, shape index: {}]   ;;  %s3625_s1 = inlined_call_operand.vmem [shape: f32[4,16], index: 1, kind: input, shape index: {}]   ;;  %s3626_s2 = inlined_call_operand.hbm [shape: f32[8,8,8], index: 2, kind: input, shape index: {}]   ;;  %s3627_s3 = inlined_call_operand.vmem [shape: f32[8,16], index: 3, kind: input, shape index: {}]   ;;  %s3628_s4 = inlined_call_operand.hbm [shape: f32[8,16,16], index: 4, kind: input, shape index: {}]   ;;  %s3629_s5 = inlined_call_operand.hbm [shape: f32[8,16,16], index: 5, kind: output, shape index: {}]  }
   0x1   :  { %11 = vsyncpa [#allocation7], 0 }
   0x2   :  { %12 = vsyncpa [#allocation5], 0  ;;  %s2921_s18 = smov [#allocation3]   ;;  %s2849_s22 = scalar_lea.hbm %s3626_s2, 1024 }
   0x3   :  { %s22_s19 = sshll.u32 %s2921_s18, 4  ;;  %p2850_p0 = scmp.ne.s32.totalorder %s3626_s2, %s2849_s22  ;;  %s23_s19 = int_to_ptr.vmem [resolvable:$true] %s22_s19 }
   0x4   :  { %p2853_p1 = scmp.lt.u32.totalorder %s2849_s22, %s3626_s2 }
   0x6   :  { %p2855_p2 = pnand %p2853_p1, %p2850_p0 }
   0x8   :  { %2858 = shalt.err (!%p2855_p2)
}
   0x9   :  { %s2859_s27 = scalar_lea.vmem %s23_s19, 1024  ;;  %p2864_p4 = scmp.lt.s32.totalorder %s23_s19, %s23_s19 }
   0xa   :  { %p2860_p3 = scmp.ne.s32.totalorder %s23_s19, %s2859_s27  ;;  %p2865_p5 = scmp.lt.s32.totalorder %s2859_s27, %s2859_s27 }
   0xc   :  { %p2866_p6 = por %p2865_p5, %p2864_p4 }
   0xe   :  { %p2867_p7 = pnand %p2866_p6, %p2860_p3 }
  0x10   :  { %2870 = shalt.err (!%p2867_p7)
}
  0x11   :  { %s2922_s28 = smov 128   ;;  %s2923_s29 = smov 8  }
  0x12   :  { %28 = dma.hbm_to_vmem [thread:$0]  %s3626_s2, 1024, %s23_s19, [#allocation4], %s2922_s28, %s2922_s28, %s2923_s29  }
  0x13   :  { %s2924_s7 = smov [#allocation6]   ;;  %s2871_s11 = scalar_lea.hbm %s3628_s4, 2048 }
  0x14   :  { %s36_s8 = sshll.u32 %s2924_s7, 4  ;;  %p2872_p8 = scmp.ne.s32.totalorder %s3628_s4, %s2871_s11  ;;  %s37_s8 = int_to_ptr.vmem [resolvable:$true] %s36_s8 }
  0x15   :  { %p2875_p9 = scmp.lt.u32.totalorder %s2871_s11, %s3628_s4 }
  0x17   :  { %p2877_p10 = pnand %p2875_p9, %p2872_p8 }
  0x19   :  { %2880 = shalt.err (!%p2877_p10)
}
  0x1a   :  { %s2881_s16 = scalar_lea.vmem %s37_s8, 2048  ;;  %p2886_p12 = scmp.lt.s32.totalorder %s37_s8, %s37_s8 }
  0x1b   :  { %p2882_p11 = scmp.ne.s32.totalorder %s37_s8, %s2881_s16  ;;  %p2887_p13 = scmp.lt.s32.totalorder %s2881_s16, %s2881_s16 }
  0x1d   :  { %p2888_p0 = por %p2887_p13, %p2886_p12 }
  0x1f   :  { %p2889_p1 = pnand %p2888_p0, %p2882_p11 }
  0x21   :  { %2892 = shalt.err (!%p2889_p1)
}
  0x22   :  { %42 = dma.hbm_to_vmem [thread:$0]  %s3628_s4, 2048, %s37_s8, [#allocation7], %s2922_s28, %s2922_s28, %s2923_s29  }
  0x23   :  { %2915 = dma.done.wait [#allocation4], 1024  }
  0x24   :  { %2916 = vsyncadd [#allocation4], 4294966272 }
  0x25   :  { %2917 = dma.done.wait [#allocation7], 2048  }
  0x26   :  { %2918 = vsyncadd [#allocation7], 4294965248  ;;  %v2925_v0 = vmov 0.0   ;;  %vm2926_vm0 = vmmov 0   ;;  %vm123_vm1 = vcmask 1043456   ;;  %vm100_vm2 = vcmask 1041409  }
  0x27   :  { %2781 = vmatprep.subr.mxu0 %v2925_v0  ;;  %2786 = vmatprep.subr.mxu1 %v2925_v0  ;;  %vm103_vm3 = vcmask 1042434   ;;  %vm106_vm4 = vcmask 1043459   ;;  %vm109_vm5 = vcmask 1044484   ;;  %vm112_vm6 = vcmask 1045509   ;;  %v2998_v1 = vld [vmem:[%s3625_s1] sm:$0xf] }
  0x28   :  { %2783 = vmatprep.mubr.msk.f32.mxu0 %vm2926_vm0, %v2925_v0  ;;  %2788 = vmatprep.mubr.msk.f32.mxu1 %vm2926_vm0, %v2925_v0  ;;  %vm115_vm7 = vcmask 1046534   ;;  %v83_v2 = vld [vmem:[%s3624_s0] sm:$0x1]  ;;  %v84_v3 = vld [vmem:[%s3624_s0 + $0x4] sm:$0x1]  ;;  %vm118_vm8 = vcmask 1047559  }
  0x29   :  { %2782 = vmatpush3.msk.msra.mxu0 %vm123_vm1, %v2998_v1  ;;  %2787 = vmatpush3.msk.msra.mxu1 %vm123_vm1, %v2998_v1  ;;  %v85_v4 = vld [vmem:[%s3624_s0 + $0x8] sm:$0x1]  ;;  %v86_v5 = vld [vmem:[%s3624_s0 + $0xc] sm:$0x1]  ;;  %v87_v6 = vld [vmem:[%s3624_s0 + $0x10] sm:$0x1] }
  0x2a   :  { %vm120_vm9 = vcmask 31744   ;;  %2791 = vmatprep.subr.mxu0 %v2925_v0  ;;  %2796 = vmatprep.subr.mxu1 %v2925_v0  ;;  %v88_v7 = vld [vmem:[%s3624_s0 + $0x14] sm:$0x1]  ;;  %v89_v8 = vld [vmem:[%s3624_s0 + $0x18] sm:$0x1]  ;;  %v99_v10 = vrot.slane %v84_v3, 7 }
  0x2b   :  { %v90_v9 = vld [vmem:[%s3624_s0 + $0x1c] sm:$0x1]  ;;  %v102_v11 = vrot.slane %v85_v4, 6  ;;  %v105_v12 = vrot.slane %v86_v5, 5  ;;  %vm65_vm10 = vcmask 130048   ;;  %v108_v13 = vrot.slane %v87_v6, 4 }
  0x2c   :  { %v111_v14 = vrot.slane %v88_v7, 3  ;;  %v114_v15 = vrot.slane %v89_v8, 2  ;;  %v117_v16 = vrot.slane %v90_v9, 1  ;;  %v312_v17 = vld [vmem:[%s3624_s0 + $0x1] sm:$0x1]  ;;  %v101_v19 = vsel %vm100_vm2, %v99_v10, %v83_v2  ;;  %v51_v38 = vld [vmem:[#allocation6 + $0x10] sm:$0xff] }
  0x2d   :  { %v313_v18 = vld [vmem:[%s3624_s0 + $0x5] sm:$0x1]  ;;  %v314_v20 = vld [vmem:[%s3624_s0 + $0x9] sm:$0x1]  ;;  %v315_v21 = vld [vmem:[%s3624_s0 + $0xd] sm:$0x1]  ;;  %v104_v23 = vsel %vm103_vm3, %v102_v11, %v101_v19 }
  0x2e   :  { %v316_v22 = vld [vmem:[%s3624_s0 + $0x11] sm:$0x1]  ;;  %v317_v24 = vld [vmem:[%s3624_s0 + $0x15] sm:$0x1]  ;;  %v318_v25 = vld [vmem:[%s3624_s0 + $0x19] sm:$0x1]  ;;  %v107_v27 = vsel %vm106_vm4, %v105_v12, %v104_v23 }
  0x2f   :  { %v319_v26 = vld [vmem:[%s3624_s0 + $0x1d] sm:$0x1]  ;;  %v328_v28 = vrot.slane %v313_v18, 7  ;;  %v330_v29 = vrot.slane %v314_v20, 6  ;;  %v332_v30 = vrot.slane %v315_v21, 5  ;;  %v49_v32 = vld [vmem:[#allocation6] sm:$0xff]  ;;  %v110_v33 = vsel %vm109_vm5, %v108_v13, %v107_v27 }
  0x30   :  { %v528_v31 = vld [vmem:[%s3624_s0 + $0x2] sm:$0x1]  ;;  %v334_v34 = vrot.slane %v316_v22, 4  ;;  %v336_v35 = vrot.slane %v317_v24, 3  ;;  %v338_v36 = vrot.slane %v318_v25, 2  ;;  %66 = vst.msk [vmem:[#allocation2] sm:$0xff] %vm65_vm10, %v49_v32  ;;  %v113_v39 = vsel %vm112_vm6, %v111_v14, %v110_v33 }
  0x31   :  { %v529_v37 = vld [vmem:[%s3624_s0 + $0x6] sm:$0x1]  ;;  %v329_v40 = vsel %vm100_vm2, %v328_v28, %v312_v17  ;;  %v340_v41 = vrot.slane %v319_v26, 1  ;;  %v530_v42 = vld [vmem:[%s3624_s0 + $0xa] sm:$0x1]  ;;  %68 = vst.msk [vmem:[#allocation2 + $0x10] sm:$0xff] %vm65_vm10, %v51_v38  ;;  %v116_v45 = vsel %vm115_vm7, %v114_v15, %v113_v39 }
  0x32   :  { %v531_v43 = vld [vmem:[%s3624_s0 + $0xe] sm:$0x1]  ;;  %v544_v44 = vrot.slane %v529_v37, 7  ;;  %v331_v46 = vsel %vm103_vm3, %v330_v29, %v329_v40  ;;  %v532_v47 = vld [vmem:[%s3624_s0 + $0x12] sm:$0x1]  ;;  %v119_v50 = vsel %vm118_vm8, %v117_v16, %v116_v45  ;;  %v546_v54 = vrot.slane %v530_v42, 6 }
  0x33   :  { %v533_v48 = vld [vmem:[%s3624_s0 + $0x16] sm:$0x1]  ;;  %v534_v49 = vld [vmem:[%s3624_s0 + $0x1a] sm:$0x1]  ;;  %v333_v51 = vsel %vm106_vm4, %v332_v30, %v331_v46  ;;  %v535_v52 = vld [vmem:[%s3624_s0 + $0x1e] sm:$0x1]  ;;  %2784 = vmatmul.mubr.msk.f32.vlgmr.msra.gmra.mrb[0].mxu0 %vm120_vm9, %v119_v50 }
  0x34   :  { %v545_v53 = vsel %vm100_vm2, %v544_v44, %v528_v31  ;;  %v53_v55 = vld [vmem:[#allocation6 + $0x20] sm:$0xff]  ;;  %v335_v56 = vsel %vm109_vm5, %v334_v34, %v333_v51  ;;  %v548_v57 = vrot.slane %v531_v43, 5  ;;  %v550_v58 = vrot.slane %v532_v47, 4  ;;  %v55_v62 = vld [vmem:[#allocation6 + $0x30] sm:$0xff]  ;;  %2792 = vmatpush3.msk.msra.mxu0 %vm123_vm1, %v2998_v1  ;;  %2793 = vmatprep.mubr.msk.f32.mxu0 %vm2926_vm0, %v2925_v0  ;;  %v746_v5 = vld [vmem:[%s3624_s0 + $0xb] sm:$0x1] }
  0x35   :  { %v552_v59 = vrot.slane %v533_v48, 3  ;;  %v744_v60 = vld [vmem:[%s3624_s0 + $0x3] sm:$0x1]  ;;  %v745_v61 = vld [vmem:[%s3624_s0 + $0x7] sm:$0x1]  ;;  %70 = vst.msk [vmem:[#allocation2 + $0x20] sm:$0xff] %vm65_vm10, %v53_v55  ;;  %v337_v63 = vsel %vm112_vm6, %v336_v35, %v335_v56  ;;  %v547_v2 = vsel %vm103_vm3, %v546_v54, %v545_v53  ;;  %2801 = vmatprep.subr.mxu0 %v2925_v0 }
  0x36   :  { %v554_v3 = vrot.slane %v534_v49, 2  ;;  %v556_v4 = vrot.slane %v535_v52, 1  ;;  %v747_v6 = vld [vmem:[%s3624_s0 + $0xf] sm:$0x1]  ;;  %72 = vst.msk [vmem:[#allocation2 + $0x30] sm:$0xff] %vm65_vm10, %v55_v62  ;;  %v339_v7 = vsel %vm115_vm7, %v338_v36, %v337_v63  ;;  %v549_v8 = vsel %vm106_vm4, %v548_v57, %v547_v2  ;;  %v3133_v17 = vld [vmem:[%s3627_s3] sm:$0xff] }
  0x37   :  { %v748_v9 = vld [vmem:[%s3624_s0 + $0x13] sm:$0x1]  ;;  %v749_v10 = vld [vmem:[%s3624_s0 + $0x17] sm:$0x1]  ;;  %v750_v11 = vld [vmem:[%s3624_s0 + $0x1b] sm:$0x1]  ;;  %v341_v12 = vsel %vm118_vm8, %v340_v41, %v339_v7  ;;  %v551_v13 = vsel %vm109_vm5, %v550_v58, %v549_v8 }
  0x38   :  { %v751_v14 = vld [vmem:[%s3624_s0 + $0x1f] sm:$0x1]  ;;  %v760_v15 = vrot.slane %v745_v61, 7  ;;  %v762_v16 = vrot.slane %v746_v5, 6  ;;  %2789 = vmatmul.mubr.msk.f32.vlgmr.msra.gmra.mrb[0].mxu1 %vm120_vm9, %v341_v12  ;;  %v553_v18 = vsel %vm112_vm6, %v552_v59, %v551_v13  ;;  %v764_v19 = vrot.slane %v747_v6, 5  ;;  %v57_v24 = vld [vmem:[#allocation6 + $0x40] sm:$0xff] }
  0x39   :  { %v766_v20 = vrot.slane %v748_v9, 4  ;;  %v768_v21 = vrot.slane %v749_v10, 3  ;;  %v961_v22 = vld [vmem:[#allocation3] sm:$0x1]  ;;  %v962_v23 = vld [vmem:[#allocation3 + $0x8] sm:$0x1]  ;;  %2797 = vmatpush3.msk.msra.mxu1 %vm123_vm1, %v2998_v1  ;;  %2798 = vmatprep.mubr.msk.f32.mxu1 %vm2926_vm0, %v2925_v0  ;;  %v555_v25 = vsel %vm115_vm7, %v554_v3, %v553_v18 }
  0x3a   :  { %v761_v26 = vsel %vm100_vm2, %v760_v15, %v744_v60  ;;  %v770_v27 = vrot.slane %v750_v11, 2  ;;  %v772_v28 = vrot.slane %v751_v14, 1  ;;  %v963_v29 = vld [vmem:[#allocation3 + $0x10] sm:$0x1]  ;;  %v964_v30 = vld [vmem:[#allocation3 + $0x18] sm:$0x1]  ;;  %2806 = vmatprep.subr.mxu1 %v2925_v0  ;;  %v557_v31 = vsel %vm118_vm8, %v556_v4, %v555_v25 }
  0x3b   :  { %vm991_vm11 = vcmask 64512   ;;  %74 = vst.msk [vmem:[#allocation2 + $0x40] sm:$0xff] %vm65_vm10, %v57_v24  ;;  %v763_v1 = vsel %vm103_vm3, %v762_v16, %v761_v26  ;;  %v965_v32 = vld [vmem:[#allocation3 + $0x20] sm:$0x1]  ;;  %v966_v33 = vld [vmem:[#allocation3 + $0x28] sm:$0x1]  ;;  %2794 = vmatmul.mubr.msk.f32.vlgmr.msra.gmra.mrb[2].mxu0 %vm120_vm9, %v557_v31 }
  0x3c   :  { %v967_v34 = vld [vmem:[#allocation3 + $0x30] sm:$0x1]  ;;  %v765_v35 = vsel %vm106_vm4, %v764_v19, %v763_v1  ;;  %v968_v36 = vld [vmem:[#allocation3 + $0x38] sm:$0x1]  ;;  %v977_v37 = vrot.slane %v962_v23, 7  ;;  %v979_v38 = vrot.slane %v963_v29, 6  ;;  %2802 = vmatpush3.msra.mxu0 %v3133_v17  ;;  %2803 = vmatprep.mubr.msk.f32.mxu0 %vm2926_vm0, %v2925_v0 }
  0x3d   :  { %v981_v39 = vrot.slane %v964_v30, 5  ;;  %v59_v40 = vld [vmem:[#allocation6 + $0x50] sm:$0xff]  ;;  %v767_v41 = vsel %vm109_vm5, %v766_v20, %v765_v35  ;;  %v983_v42 = vrot.slane %v965_v32, 4  ;;  %v985_v43 = vrot.slane %v966_v33, 3  ;;  %v1179_v45 = vld [vmem:[#allocation3 + $0x1] sm:$0x1]  ;;  %2811 = vmatprep.subr.mxu0 %v2925_v0 }
  0x3e   :  { %v987_v44 = vrot.slane %v967_v34, 2  ;;  %v61_v46 = vld [vmem:[#allocation6 + $0x60] sm:$0xff]  ;;  %76 = vst.msk [vmem:[#allocation2 + $0x50] sm:$0xff] %vm65_vm10, %v59_v40  ;;  %v769_v47 = vsel %vm112_vm6, %v768_v21, %v767_v41  ;;  %v978_v48 = vsel %vm100_vm2, %v977_v37, %v961_v22  ;;  %v989_v49 = vrot.slane %v968_v36, 1  ;;  %v1180_v50 = vld [vmem:[#allocation3 + $0x9] sm:$0x1] }
  0x3f   :  { %v1181_v51 = vld [vmem:[#allocation3 + $0x11] sm:$0x1]  ;;  %78 = vst.msk [vmem:[#allocation2 + $0x60] sm:$0xff] %vm65_vm10, %v61_v46  ;;  %v771_v53 = vsel %vm115_vm7, %v770_v27, %v769_v47  ;;  %v980_v54 = vsel %vm103_vm3, %v979_v38, %v978_v48  ;;  %v1182_v55 = vld [vmem:[#allocation3 + $0x19] sm:$0x1]  ;;  %v1195_v62 = vrot.slane %v1180_v50, 7 }
  0x40   :  { %v63_v52 = vld [vmem:[#allocation6 + $0x70] sm:$0xff]  ;;  %v1183_v56 = vld [vmem:[#allocation3 + $0x21] sm:$0x1]  ;;  %v1184_v57 = vld [vmem:[#allocation3 + $0x29] sm:$0x1]  ;;  %v773_v58 = vsel %vm118_vm8, %v772_v28, %v771_v53  ;;  %v982_v59 = vsel %vm106_vm4, %v981_v39, %v980_v54  ;;  %v1197_v63 = vrot.slane %v1181_v51, 6 }
  0x41   :  { %80 = vst.msk [vmem:[#allocation2 + $0x70] sm:$0xff] %vm65_vm10, %v63_v52  ;;  %v1185_v60 = vld [vmem:[#allocation3 + $0x31] sm:$0x1]  ;;  %v1186_v61 = vld [vmem:[#allocation3 + $0x39] sm:$0x1]  ;;  %2799 = vmatmul.mubr.msk.f32.vlgmr.msra.gmra.mrb[2].mxu1 %vm120_vm9, %v773_v58  ;;  %v984_v2 = vsel %vm109_vm5, %v983_v42, %v982_v59  ;;  %v1199_v3 = vrot.slane %v1182_v55, 5  ;;  %v1196_v8 = vsel %vm100_vm2, %v1195_v62, %v1179_v45 }
  0x42   :  { %v1201_v4 = vrot.slane %v1183_v56, 4  ;;  %v1203_v5 = vrot.slane %v1184_v57, 3  ;;  %v1395_v6 = vld [vmem:[#allocation3 + $0x2] sm:$0x1]  ;;  %2807 = vmatpush3.msra.mxu1 %v3133_v17  ;;  %2808 = vmatprep.mubr.msk.f32.mxu1 %vm2926_vm0, %v2925_v0  ;;  %v986_v7 = vsel %vm112_vm6, %v985_v43, %v984_v2  ;;  %v1205_v9 = vrot.slane %v1185_v60, 2  ;;  %s2928_s0 = smov [#allocation8]  }
  0x43   :  { %v1207_v10 = vrot.slane %v1186_v61, 1  ;;  %v1396_v11 = vld [vmem:[#allocation3 + $0xa] sm:$0x1]  ;;  %v1397_v12 = vld [vmem:[#allocation3 + $0x12] sm:$0x1]  ;;  %2816 = vmatprep.subr.mxu1 %v2925_v0  ;;  %v988_v13 = vsel %vm115_vm7, %v987_v44, %v986_v7  ;;  %v1198_v14 = vsel %vm103_vm3, %v1197_v63, %v1196_v8  ;;  %vm303_vm12 = vcmask 125952  }
  0x44   :  { %v1398_v15 = vld [vmem:[#allocation3 + $0x1a] sm:$0x1]  ;;  %v1399_v16 = vld [vmem:[#allocation3 + $0x22] sm:$0x1]  ;;  %v1400_v18 = vld [vmem:[#allocation3 + $0x2a] sm:$0x1]  ;;  %v990_v19 = vsel %vm118_vm8, %v989_v49, %v988_v13  ;;  %v1200_v20 = vsel %vm106_vm4, %v1199_v3, %v1198_v14 }
  0x45   :  { %v1401_v21 = vld [vmem:[#allocation3 + $0x32] sm:$0x1]  ;;  %v1402_v22 = vld [vmem:[#allocation3 + $0x3a] sm:$0x1]  ;;  %v1411_v23 = vrot.slane %v1396_v11, 7  ;;  %v1413_v24 = vrot.slane %v1397_v12, 6  ;;  %2804 = vmatmul.mubr.msk.f32.vlgmr.msra.gmra.mrb[4].mxu0 %vm991_vm11, %v990_v19  ;;  %v1202_v25 = vsel %vm109_vm5, %v1201_v4, %v1200_v20 }
  0x46   :  { %v1415_v26 = vrot.slane %v1398_v15, 5  ;;  %v1417_v27 = vrot.slane %v1399_v16, 4  ;;  %v1419_v28 = vrot.slane %v1400_v18, 3  ;;  %v1611_v29 = vld [vmem:[#allocation3 + $0x3] sm:$0x1]  ;;  %v1204_v30 = vsel %vm112_vm6, %v1203_v5, %v1202_v25  ;;  %2812 = vmatpush3.msra.mxu0 %v3133_v17  ;;  %2813 = vmatprep.mubr.msk.f32.mxu0 %vm2926_vm0, %v2925_v0  ;;  %s2728_s3 = sshll.u32 %s2928_s0, 4  ;;  %s2729_s3 = int_to_ptr.vmem [resolvable:$true] %s2728_s3 }
  0x47   :  { %v1412_v31 = vsel %vm100_vm2, %v1411_v23, %v1395_v6  ;;  %v1421_v1 = vrot.slane %v1401_v21, 2  ;;  %v1423_v32 = vrot.slane %v1402_v22, 1  ;;  %v1612_v33 = vld [vmem:[#allocation3 + $0xb] sm:$0x1]  ;;  %v1613_v34 = vld [vmem:[#allocation3 + $0x13] sm:$0x1]  ;;  %v1206_v35 = vsel %vm115_vm7, %v1205_v9, %v1204_v30  ;;  %2821 = vmatprep.subr.mxu0 %v2925_v0  ;;  %p2898_p3 = scmp.lt.s32.totalorder %s2729_s3, %s2729_s3 }
  0x48   :  { %v1414_v36 = vsel %vm103_vm3, %v1413_v24, %v1412_v31  ;;  %v1614_v37 = vld [vmem:[#allocation3 + $0x1b] sm:$0x1]  ;;  %v1615_v38 = vld [vmem:[#allocation3 + $0x23] sm:$0x1]  ;;  %v1616_v39 = vld [vmem:[#allocation3 + $0x2b] sm:$0x1]  ;;  %v1208_v40 = vsel %vm118_vm8, %v1207_v10, %v1206_v35 }
  0x49   :  { %v1416_v41 = vsel %vm106_vm4, %v1415_v26, %v1414_v36  ;;  %v1617_v42 = vld [vmem:[#allocation3 + $0x33] sm:$0x1]  ;;  %v1618_v43 = vld [vmem:[#allocation3 + $0x3b] sm:$0x1]  ;;  %v1627_v44 = vrot.slane %v1612_v33, 7  ;;  %v1629_v45 = vrot.slane %v1613_v34, 6  ;;  %2809 = vmatmul.mubr.msk.f32.vlgmr.msra.gmra.mrb[4].mxu1 %vm991_vm11, %v1208_v40 }
  0x4a   :  { %v1418_v46 = vsel %vm109_vm5, %v1417_v27, %v1416_v41  ;;  %v1631_v47 = vrot.slane %v1614_v37, 5  ;;  %v1633_v48 = vrot.slane %v1615_v38, 4  ;;  %v1635_v49 = vrot.slane %v1616_v39, 3  ;;  %v1827_v50 = vld [vmem:[#allocation3 + $0x4] sm:$0x1]  ;;  %2817 = vmatpush3.msra.mxu1 %v3133_v17  ;;  %2818 = vmatprep.mubr.msk.f32.mxu1 %vm2926_vm0, %v2925_v0  ;;  %s2893_s9 = scalar_lea.vmem %s2729_s3, 2048 }
  0x4b   :  { %v1420_v51 = vsel %vm112_vm6, %v1419_v28, %v1418_v46  ;;  %v1628_v52 = vsel %vm100_vm2, %v1627_v44, %v1611_v29  ;;  %v1637_v53 = vrot.slane %v1617_v42, 2  ;;  %v1639_v54 = vrot.slane %v1618_v43, 1  ;;  %v1828_v55 = vld [vmem:[#allocation3 + $0xc] sm:$0x1]  ;;  %v1829_v56 = vld [vmem:[#allocation3 + $0x14] sm:$0x1]  ;;  %2826 = vmatprep.subr.mxu1 %v2925_v0  ;;  %p2894_p2 = scmp.ne.s32.totalorder %s2729_s3, %s2893_s9  ;;  %p2899_p4 = scmp.lt.s32.totalorder %s2893_s9, %s2893_s9 }
  0x4c   :  { %v1422_v57 = vsel %vm115_vm7, %v1421_v1, %v1420_v51  ;;  %v1630_v58 = vsel %vm103_vm3, %v1629_v45, %v1628_v52  ;;  %v1830_v59 = vld [vmem:[#allocation3 + $0x1c] sm:$0x1]  ;;  %v1831_v60 = vld [vmem:[#allocation3 + $0x24] sm:$0x1]  ;;  %v1832_v61 = vld [vmem:[#allocation3 + $0x2c] sm:$0x1] }
  0x4d   :  { %v1424_v62 = vsel %vm118_vm8, %v1423_v32, %v1422_v57  ;;  %v1632_v63 = vsel %vm106_vm4, %v1631_v47, %v1630_v58  ;;  %v1833_v2 = vld [vmem:[#allocation3 + $0x34] sm:$0x1]  ;;  %v1834_v3 = vld [vmem:[#allocation3 + $0x3c] sm:$0x1]  ;;  %v1843_v4 = vrot.slane %v1828_v55, 7  ;;  %v1845_v5 = vrot.slane %v1829_v56, 6  ;;  %p2900_p5 = por %p2899_p4, %p2898_p3 }
  0x4e   :  { %2814 = vmatmul.mubr.msk.f32.vlgmr.msra.gmra.mrb[6].mxu0 %vm991_vm11, %v1424_v62  ;;  %v1634_v6 = vsel %vm109_vm5, %v1633_v48, %v1632_v63  ;;  %v1847_v7 = vrot.slane %v1830_v59, 5  ;;  %v1849_v8 = vrot.slane %v1831_v60, 4  ;;  %v1851_v9 = vrot.slane %v1832_v61, 3  ;;  %v2043_v10 = vld [vmem:[#allocation3 + $0x5] sm:$0x1] }
  0x4f   :  { %v1636_v11 = vsel %vm112_vm6, %v1635_v49, %v1634_v6  ;;  %2822 = vmatpush3.msra.mxu0 %v3133_v17  ;;  %2823 = vmatprep.mubr.msk.f32.mxu0 %vm2926_vm0, %v2925_v0  ;;  %v1844_v12 = vsel %vm100_vm2, %v1843_v4, %v1827_v50  ;;  %v1853_v13 = vrot.slane %v1833_v2, 2  ;;  %v1855_v14 = vrot.slane %v1834_v3, 1  ;;  %v2044_v15 = vld [vmem:[#allocation3 + $0xd] sm:$0x1]  ;;  %v2045_v16 = vld [vmem:[#allocation3 + $0x15] sm:$0x1]  ;;  %p2901_p6 = pnand %p2900_p5, %p2894_p2 }
  0x50   :  { %v1638_v18 = vsel %vm115_vm7, %v1637_v53, %v1636_v11  ;;  %2831 = vmatprep.subr.mxu0 %v2925_v0  ;;  %v1846_v19 = vsel %vm103_vm3, %v1845_v5, %v1844_v12  ;;  %v2046_v20 = vld [vmem:[#allocation3 + $0x1d] sm:$0x1]  ;;  %v2047_v21 = vld [vmem:[#allocation3 + $0x25] sm:$0x1]  ;;  %v2048_v22 = vld [vmem:[#allocation3 + $0x2d] sm:$0x1] }
  0x51   :  { %v1640_v23 = vsel %vm118_vm8, %v1639_v54, %v1638_v18  ;;  %v1848_v24 = vsel %vm106_vm4, %v1847_v7, %v1846_v19  ;;  %v2049_v25 = vld [vmem:[#allocation3 + $0x35] sm:$0x1]  ;;  %v2050_v26 = vld [vmem:[#allocation3 + $0x3d] sm:$0x1]  ;;  %v2059_v27 = vrot.slane %v2044_v15, 7  ;;  %v2061_v28 = vrot.slane %v2045_v16, 6 }
  0x52   :  { %2819 = vmatmul.mubr.msk.f32.vlgmr.msra.gmra.mrb[6].mxu1 %vm991_vm11, %v1640_v23  ;;  %v1850_v29 = vsel %vm109_vm5, %v1849_v8, %v1848_v24  ;;  %v2063_v30 = vrot.slane %v2046_v20, 5  ;;  %v2065_v31 = vrot.slane %v2047_v21, 4  ;;  %v2067_v1 = vrot.slane %v2048_v22, 3  ;;  %v2259_v32 = vld [vmem:[#allocation3 + $0x6] sm:$0x1] }
  0x53   :  { %2827 = vmatpush3.msra.mxu1 %v3133_v17  ;;  %2828 = vmatprep.mubr.msk.f32.mxu1 %vm2926_vm0, %v2925_v0  ;;  %v1852_v33 = vsel %vm112_vm6, %v1851_v9, %v1850_v29  ;;  %v2060_v34 = vsel %vm100_vm2, %v2059_v27, %v2043_v10  ;;  %v2069_v35 = vrot.slane %v2049_v25, 2  ;;  %v2071_v36 = vrot.slane %v2050_v26, 1  ;;  %v2260_v37 = vld [vmem:[#allocation3 + $0xe] sm:$0x1]  ;;  %v2261_v38 = vld [vmem:[#allocation3 + $0x16] sm:$0x1] }
  0x54   :  { %2836 = vmatprep.subr.mxu1 %v2925_v0  ;;  %v1854_v39 = vsel %vm115_vm7, %v1853_v13, %v1852_v33  ;;  %v2062_v40 = vsel %vm103_vm3, %v2061_v28, %v2060_v34  ;;  %v2262_v41 = vld [vmem:[#allocation3 + $0x1e] sm:$0x1]  ;;  %v2263_v42 = vld [vmem:[#allocation3 + $0x26] sm:$0x1]  ;;  %v2264_v43 = vld [vmem:[#allocation3 + $0x2e] sm:$0x1]  ;;  %v210_v34 = vlaneseq }
  0x55   :  { %v1856_v44 = vsel %vm118_vm8, %v1855_v14, %v1854_v39  ;;  %v2064_v45 = vsel %vm106_vm4, %v2063_v30, %v2062_v40  ;;  %v2265_v46 = vld [vmem:[#allocation3 + $0x36] sm:$0x1]  ;;  %v2266_v47 = vld [vmem:[#allocation3 + $0x3e] sm:$0x1]  ;;  %v2275_v48 = vrot.slane %v2260_v37, 7  ;;  %v2277_v49 = vrot.slane %v2261_v38, 6 }
  0x56   :  { %2824 = vmatmul.mubr.msk.f32.vlgmr.msra.gmra.mrb[8].mxu0 %vm991_vm11, %v1856_v44  ;;  %v2066_v50 = vsel %vm109_vm5, %v2065_v31, %v2064_v45  ;;  %v2279_v51 = vrot.slane %v2262_v41, 5  ;;  %v2281_v52 = vrot.slane %v2263_v42, 4  ;;  %v2283_v53 = vrot.slane %v2264_v43, 3  ;;  %v2475_v54 = vld [vmem:[#allocation3 + $0x7] sm:$0x1]  ;;  %v50_v25 = vld [vmem:[#allocation6 + $0x8] sm:$0xff] }
  0x57   :  { %v2068_v55 = vsel %vm112_vm6, %v2067_v1, %v2066_v50  ;;  %2832 = vmatpush3.msra.mxu0 %v3133_v17  ;;  %2833 = vmatprep.mubr.msk.f32.mxu0 %vm2926_vm0, %v2925_v0  ;;  %v2276_v56 = vsel %vm100_vm2, %v2275_v48, %v2259_v32  ;;  %v2285_v57 = vrot.slane %v2265_v46, 2  ;;  %v2287_v58 = vrot.slane %v2266_v47, 1  ;;  %v2476_v59 = vld [vmem:[#allocation3 + $0xf] sm:$0x1]  ;;  %v2477_v60 = vld [vmem:[#allocation3 + $0x17] sm:$0x1] }
  0x58   :  { %v2070_v61 = vsel %vm115_vm7, %v2069_v35, %v2068_v55  ;;  %v2278_v62 = vsel %vm103_vm3, %v2277_v49, %v2276_v56  ;;  %v2478_v63 = vld [vmem:[#allocation3 + $0x1f] sm:$0x1]  ;;  %v2479_v2 = vld [vmem:[#allocation3 + $0x27] sm:$0x1]  ;;  %v2480_v3 = vld [vmem:[#allocation3 + $0x2f] sm:$0x1] }
  0x59   :  { %v2072_v4 = vsel %vm118_vm8, %v2071_v36, %v2070_v61  ;;  %v2280_v5 = vsel %vm106_vm4, %v2279_v51, %v2278_v62  ;;  %v2481_v6 = vld [vmem:[#allocation3 + $0x37] sm:$0x1]  ;;  %v2491_v7 = vrot.slane %v2476_v59, 7  ;;  %v2493_v8 = vrot.slane %v2477_v60, 6  ;;  %v2482_v10 = vld [vmem:[#allocation3 + $0x3f] sm:$0x1] }
  0x5a   :  { %2829 = vmatmul.mubr.msk.f32.vlgmr.msra.gmra.mrb[8].mxu1 %vm991_vm11, %v2072_v4  ;;  %v2282_v9 = vsel %vm109_vm5, %v2281_v52, %v2280_v5  ;;  %v2495_v11 = vrot.slane %v2478_v63, 5  ;;  %v2497_v12 = vrot.slane %v2479_v2, 4  ;;  %v2499_v15 = vrot.slane %v2480_v3, 3  ;;  %v52_v26 = vld [vmem:[#allocation6 + $0x18] sm:$0xff]  ;;  %v54_v27 = vld [vmem:[#allocation6 + $0x28] sm:$0xff]  ;;  %67 = vst.msk [vmem:[#allocation2 + $0x8] sm:$0xff] %vm65_vm10, %v50_v25 }
  0x5b   :  { %2837 = vmatpush3.msra.mxu1 %v3133_v17  ;;  %2838 = vmatprep.mubr.msk.f32.mxu1 %vm2926_vm0, %v2925_v0  ;;  %v2284_v13 = vsel %vm112_vm6, %v2283_v53, %v2282_v9  ;;  %v2492_v14 = vsel %vm100_vm2, %v2491_v7, %v2475_v54  ;;  %v2501_v19 = vrot.slane %v2481_v6, 2  ;;  %v2503_v22 = vrot.slane %v2482_v10, 1  ;;  %v56_v28 = vld [vmem:[#allocation6 + $0x38] sm:$0xff]  ;;  %v58_v29 = vld [vmem:[#allocation6 + $0x48] sm:$0xff]  ;;  %69 = vst.msk [vmem:[#allocation2 + $0x18] sm:$0xff] %vm65_vm10, %v52_v26 }
  0x5c   :  { %v2286_v16 = vsel %vm115_vm7, %v2285_v57, %v2284_v13  ;;  %v2494_v18 = vsel %vm103_vm3, %v2493_v8, %v2492_v14  ;;  %v60_v30 = vld [vmem:[#allocation6 + $0x58] sm:$0xff]  ;;  %71 = vst.msk [vmem:[#allocation2 + $0x28] sm:$0xff] %vm65_vm10, %v54_v27  ;;  %v62_v31 = vld [vmem:[#allocation6 + $0x68] sm:$0xff]  ;;  %73 = vst.msk [vmem:[#allocation2 + $0x38] sm:$0xff] %vm65_vm10, %v56_v28  ;;  %v2927_v32 = vmov 1966171168  }
  0x5d   :  { %v2288_v20 = vsel %vm118_vm8, %v2287_v58, %v2286_v16  ;;  %v2496_v21 = vsel %vm106_vm4, %v2495_v11, %v2494_v18  ;;  %v64_v1 = vld [vmem:[#allocation6 + $0x78] sm:$0xff]  ;;  %75 = vst.msk [vmem:[#allocation2 + $0x48] sm:$0xff] %vm65_vm10, %v58_v29  ;;  %77 = vst.msk [vmem:[#allocation2 + $0x58] sm:$0xff] %vm65_vm10, %v60_v30  ;;  %v208_v33 = vunpack.c.l.s4 %v2927_v32  ;;  %v211_v36 = vshrl.u32 %v210_v34, 7  ;;  %v197_v47 = vld [vmem:[#allocation2] sm:$0xf] }
  0x5e   :  { %2834 = vmatmul.mubr.msk.f32.vlgmr.msra.gmra.mrb[10].mxu0 %vm991_vm11, %v2288_v20  ;;  %v2498_v17 = vsel %vm109_vm5, %v2497_v12, %v2496_v21  ;;  %79 = vst.msk [vmem:[#allocation2 + $0x68] sm:$0xff] %vm65_vm10, %v62_v31  ;;  %81 = vst.msk [vmem:[#allocation2 + $0x78] sm:$0xff] %vm65_vm10, %v64_v1  ;;  %v198_v53 = vld [vmem:[#allocation2 + $0x10] sm:$0xf]  ;;  %v199_v54 = vld [vmem:[#allocation2 + $0x20] sm:$0xf] }
  0x5f   :  { %v2500_v0 = vsel %vm112_vm6, %v2499_v15, %v2498_v17  ;;  %v209_v35 = vunpack.c.0.s8 %v208_v33  ;;  %v3262_v42 = vsub.s32 0, %v211_v36  ;;  %v200_v58 = vld [vmem:[#allocation2 + $0x30] sm:$0xf]  ;;  %v201_v59 = vld [vmem:[#allocation2 + $0x40] sm:$0xf]  ;;  %vm1170_vm13 = vcmask 123904  }
  0x60   :  { %v2502_v23 = vsel %vm115_vm7, %v2501_v19, %v2500_v0  ;;  %v202_v3 = vld [vmem:[#allocation2 + $0x50] sm:$0xf]  ;;  %v203_v4 = vld [vmem:[#allocation2 + $0x60] sm:$0xf]  ;;  %v414_v1 = vld [vmem:[#allocation2 + $0x4] sm:$0xf] }
  0x61   :  { %v2504_v24 = vsel %vm118_vm8, %v2503_v22, %v2502_v23  ;;  %v3259_v37 = vsub.s32 %v209_v35, %v211_v36  ;;  %v204_v14 = vld [vmem:[#allocation2 + $0x70] sm:$0xf]  ;;  %v415_v32 = vld [vmem:[#allocation2 + $0x14] sm:$0xf]  ;;  %v418_v33 = vld [vmem:[#allocation2 + $0x44] sm:$0xf] }
  0x62   :  { %2839 = vmatmul.mubr.msk.f32.vlgmr.msra.gmra.mrb[10].mxu1 %vm991_vm11, %v2504_v24 }
 0x106   :  { %v193_v38 = vpop.f32.mrb[0].mxu0 }
 0x107   :  { %v206_v39 = vcombine.high %v193_v38, %v193_v38  ;;  %v213_v40 = vrot.slane %v193_v38, %v3259_v37  ;;  %v2785_v41 = vpop.f32.mrb[1].mxu0 }
 0x108   :  { %v419_v41 = vld [vmem:[#allocation2 + $0x54] sm:$0xf] }
 0x109   :  { %v220_v43 = vrot.slane %v206_v39, %v3259_v37  ;;  %v221_v44 = vcombine.high %v213_v40, %v213_v40  ;;  %v229_v45 = vrot.slane %v213_v40, %v3259_v37  ;;  %v416_v39 = vld [vmem:[#allocation2 + $0x24] sm:$0xf]  ;;  %v417_v40 = vld [vmem:[#allocation2 + $0x34] sm:$0xf] }
 0x10b   :  { %v410_v46 = vpop.f32.mrb[0].mxu1  ;;  %v222_v48 = vcombine.high %v220_v43, %v220_v43  ;;  %v236_v49 = vrot.slane %v220_v43, %v3259_v37  ;;  %v243_v50 = vrot.slane %v221_v44, %v3259_v37  ;;  %v251_v51 = vcombine.high %v229_v45, %v229_v45 }
 0x10c   :  { %v2790_v52 = vpop.f32.mrb[1].mxu1  ;;  %v258_v55 = vrot.slane %v229_v45, %v3262_v42  ;;  %v423_v56 = vcombine.high %v410_v46, %v410_v46  ;;  %v430_v57 = vrot.slane %v410_v46, %v3259_v37 }
 0x10d   :  { %v250_v60 = vrot.slane %v222_v48, %v3259_v37  ;;  %v252_v61 = vcombine.high %v236_v49, %v236_v49  ;;  %v253_v62 = vcombine.high %v243_v50, %v243_v50  ;;  %v262_v63 = vrot.slane %v243_v50, %v3262_v42 }
 0x10e   :  { %v626_v2 = vpop.f32.mrb[2].mxu0  ;;  %v266_v5 = vrot.slane %v251_v51, %v3262_v42  ;;  %v274_v6 = vrot.slane %v236_v49, %v3262_v42  ;;  %v295_v7 = vadd.f32 %v258_v55, %v197_v47  ;;  %v437_v8 = vrot.slane %v423_v56, %v3259_v37  ;;  %v420_v47 = vld [vmem:[#allocation2 + $0x64] sm:$0xf] }
 0x10f   :  { %v2795_v9 = vpop.f32.mrb[3].mxu0  ;;  %v254_v10 = vcombine.high %v250_v60, %v250_v60  ;;  %v270_v11 = vrot.slane %v253_v62, %v3262_v42  ;;  %v278_v12 = vrot.slane %v250_v60, %v3262_v42  ;;  %v282_v13 = vrot.slane %v252_v61, %v3262_v42 }
 0x110   :  { %v296_v15 = vadd.f32 %v262_v63, %v198_v53  ;;  %v297_v16 = vadd.f32 %v266_v5, %v199_v54  ;;  %v299_v18 = vadd.f32 %v274_v6, %v201_v59  ;;  %304 = vst.msk [vmem:[#allocation2] sm:$0xf] %vm303_vm12, %v295_v7  ;;  %v438_v19 = vcombine.high %v430_v57, %v430_v57  ;;  %v421_v53 = vld [vmem:[#allocation2 + $0x74] sm:$0xf]  ;;  %v630_v9 = vld [vmem:[#allocation2 + $0x8] sm:$0xf] }
 0x111   :  { %v286_v20 = vrot.slane %v254_v10, %v3262_v42  ;;  %v298_v21 = vadd.f32 %v270_v11, %v200_v58  ;;  %v300_v22 = vadd.f32 %v278_v12, %v202_v3  ;;  %v301_v17 = vadd.f32 %v282_v13, %v203_v4  ;;  %v634_v10 = vld [vmem:[#allocation2 + $0x48] sm:$0xf] }
 0x112   :  { %305 = vst.msk [vmem:[#allocation2 + $0x10] sm:$0xf] %vm303_vm12, %v296_v15  ;;  %306 = vst.msk [vmem:[#allocation2 + $0x20] sm:$0xf] %vm303_vm12, %v297_v16  ;;  %v439_v0 = vcombine.high %v437_v8, %v437_v8  ;;  %v446_v23 = vrot.slane %v430_v57, %v3259_v37  ;;  %v453_v24 = vrot.slane %v437_v8, %v3259_v37  ;;  %v631_v16 = vld [vmem:[#allocation2 + $0x18] sm:$0xf] }
 0x113   :  { %308 = vst.msk [vmem:[#allocation2 + $0x40] sm:$0xf] %vm303_vm12, %v299_v18  ;;  %v460_v25 = vrot.slane %v438_v19, %v3259_v37  ;;  %v302_v27 = vadd.f32 %v286_v20, %v204_v14  ;;  %307 = vst.msk [vmem:[#allocation2 + $0x30] sm:$0xf] %vm303_vm12, %v298_v21  ;;  %v639_v28 = vcombine.high %v626_v2, %v626_v2  ;;  %v632_v18 = vld [vmem:[#allocation2 + $0x28] sm:$0xf] }
 0x114   :  { %v842_v26 = vpop.f32.mrb[2].mxu1  ;;  %309 = vst.msk [vmem:[#allocation2 + $0x50] sm:$0xf] %vm303_vm12, %v300_v22  ;;  %310 = vst.msk [vmem:[#allocation2 + $0x60] sm:$0xf] %vm303_vm12, %v301_v17  ;;  %v646_v29 = vrot.slane %v626_v2, %v3259_v37  ;;  %v467_v34 = vrot.slane %v439_v0, %v3259_v37  ;;  %v468_v35 = vcombine.high %v446_v23, %v446_v23 }
 0x115   :  { %v855_v30 = vcombine.high %v842_v26, %v842_v26  ;;  %v2800_v31 = vpop.f32.mrb[3].mxu1  ;;  %v469_v36 = vcombine.high %v453_v24, %v453_v24  ;;  %v470_v38 = vcombine.high %v460_v25, %v460_v25  ;;  %311 = vst.msk [vmem:[#allocation2 + $0x70] sm:$0xf] %vm303_vm12, %v302_v27  ;;  %v475_v43 = vrot.slane %v446_v23, %v3262_v42  ;;  %v635_v17 = vld [vmem:[#allocation2 + $0x58] sm:$0xf] }
 0x116   :  { %v479_v44 = vrot.slane %v460_v25, %v3262_v42  ;;  %v491_v45 = vrot.slane %v453_v24, %v3262_v42  ;;  %v653_v46 = vrot.slane %v639_v28, %v3259_v37  ;;  %v471_v48 = vcombine.high %v467_v34, %v467_v34  ;;  %v636_v0 = vld [vmem:[#allocation2 + $0x68] sm:$0xf]  ;;  %v633_v27 = vld [vmem:[#allocation2 + $0x38] sm:$0xf] }
 0x117   :  { %v483_v49 = vrot.slane %v468_v35, %v3262_v42  ;;  %v487_v50 = vrot.slane %v470_v38, %v3262_v42  ;;  %v495_v51 = vrot.slane %v467_v34, %v3262_v42  ;;  %v499_v54 = vrot.slane %v469_v36, %v3262_v42  ;;  %v637_v28 = vld [vmem:[#allocation2 + $0x78] sm:$0xf] }
 0x118   :  { %v3299_v52 = vpop.f32.mrb[4].mxu0  ;;  %v512_v55 = vadd.f32 %v475_v43, %v414_v1  ;;  %v513_v56 = vadd.f32 %v479_v44, %v415_v32  ;;  %v516_v57 = vadd.f32 %v491_v45, %v418_v33  ;;  %v503_v59 = vrot.slane %v471_v48, %v3262_v42  ;;  %v850_v48 = vld [vmem:[#allocation2 + $0x4c] sm:$0xf] }
 0x119   :  { %v2805_v58 = vpop.f32.mrb[5].mxu0  ;;  %v514_v60 = vadd.f32 %v483_v49, %v416_v39  ;;  %v515_v61 = vadd.f32 %v487_v50, %v417_v40  ;;  %v517_v62 = vadd.f32 %v495_v51, %v419_v41  ;;  %v518_v63 = vadd.f32 %v499_v54, %v420_v47  ;;  %v846_v47 = vld [vmem:[#allocation2 + $0xc] sm:$0xf]  ;;  %v847_v51 = vld [vmem:[#allocation2 + $0x1c] sm:$0xf] }
 0x11a   :  { %520 = vst.msk [vmem:[#allocation2 + $0x4] sm:$0xf] %vm303_vm12, %v512_v55  ;;  %521 = vst.msk [vmem:[#allocation2 + $0x14] sm:$0xf] %vm303_vm12, %v513_v56  ;;  %v654_v2 = vcombine.high %v646_v29, %v646_v29  ;;  %v655_v3 = vcombine.high %v653_v46, %v653_v46  ;;  %v662_v4 = vrot.slane %v646_v29, %v3259_v37 }
 0x11b   :  { %524 = vst.msk [vmem:[#allocation2 + $0x44] sm:$0xf] %vm303_vm12, %v516_v57  ;;  %v519_v5 = vadd.f32 %v503_v59, %v421_v53  ;;  %522 = vst.msk [vmem:[#allocation2 + $0x24] sm:$0xf] %vm303_vm12, %v514_v60  ;;  %v669_v6 = vrot.slane %v653_v46, %v3259_v37  ;;  %v862_v7 = vrot.slane %v842_v26, %v3259_v37  ;;  %v851_v53 = vld [vmem:[#allocation2 + $0x5c] sm:$0xf] }
 0x11c   :  { %523 = vst.msk [vmem:[#allocation2 + $0x34] sm:$0xf] %vm303_vm12, %v515_v61  ;;  %525 = vst.msk [vmem:[#allocation2 + $0x54] sm:$0xf] %vm303_vm12, %v517_v62  ;;  %v869_v8 = vrot.slane %v855_v30, %v3259_v37  ;;  %v676_v11 = vrot.slane %v654_v2, %v3259_v37  ;;  %v683_v12 = vrot.slane %v655_v3, %v3259_v37  ;;  %v3317_v15 = vpop.f32.mrb[4].mxu1 }
 0x11d   :  { %526 = vst.msk [vmem:[#allocation2 + $0x64] sm:$0xf] %vm303_vm12, %v518_v63  ;;  %v684_v13 = vcombine.high %v662_v4, %v662_v4  ;;  %v691_v14 = vrot.slane %v662_v4, %v3262_v42  ;;  %527 = vst.msk [vmem:[#allocation2 + $0x74] sm:$0xf] %vm303_vm12, %v519_v5  ;;  %v685_v19 = vcombine.high %v669_v6, %v669_v6  ;;  %v2810_v32 = vpop.f32.mrb[5].mxu1 }
 0x11e   :  { %v707_v20 = vrot.slane %v669_v6, %v3262_v42  ;;  %v870_v21 = vcombine.high %v862_v7, %v862_v7  ;;  %v871_v22 = vcombine.high %v869_v8, %v869_v8  ;;  %v686_v23 = vcombine.high %v676_v11, %v676_v11  ;;  %v848_v59 = vld [vmem:[#allocation2 + $0x2c] sm:$0xf]  ;;  %v849_v3 = vld [vmem:[#allocation2 + $0x3c] sm:$0xf] }
 0x11f   :  { %v687_v24 = vcombine.high %v683_v12, %v683_v12  ;;  %v695_v25 = vrot.slane %v676_v11, %v3262_v42  ;;  %v699_v26 = vrot.slane %v684_v13, %v3262_v42  ;;  %v711_v29 = vrot.slane %v683_v12, %v3262_v42  ;;  %v852_v60 = vld [vmem:[#allocation2 + $0x6c] sm:$0xf]  ;;  %v853_v4 = vld [vmem:[#allocation2 + $0x7c] sm:$0xf] }
 0x120   :  { %v715_v30 = vrot.slane %v685_v19, %v3262_v42  ;;  %v728_v31 = vadd.f32 %v691_v14, %v630_v9  ;;  %v732_v1 = vadd.f32 %v707_v20, %v634_v10  ;;  %v703_v34 = vrot.slane %v686_v23, %v3262_v42 }
 0x121   :  { %v3325_v33 = vpop.f32.mrb[6].mxu0  ;;  %v719_v35 = vrot.slane %v687_v24, %v3262_v42  ;;  %v729_v36 = vadd.f32 %v695_v25, %v631_v16  ;;  %v730_v38 = vadd.f32 %v699_v26, %v632_v18  ;;  %v733_v40 = vadd.f32 %v711_v29, %v635_v17  ;;  %v1064_v29 = vld [vmem:[#allocation2] sm:$0x3] }
 0x122   :  { %v2815_v39 = vpop.f32.mrb[7].mxu0  ;;  %v734_v41 = vadd.f32 %v715_v30, %v636_v0  ;;  %736 = vst.msk [vmem:[#allocation2 + $0x8] sm:$0xf] %vm303_vm12, %v728_v31  ;;  %740 = vst.msk [vmem:[#allocation2 + $0x48] sm:$0xf] %vm303_vm12, %v732_v1  ;;  %v878_v43 = vrot.slane %v862_v7, %v3259_v37  ;;  %v885_v44 = vrot.slane %v869_v8, %v3259_v37 }
 0x123   :  { %v731_v45 = vadd.f32 %v703_v34, %v633_v27  ;;  %v735_v46 = vadd.f32 %v719_v35, %v637_v28  ;;  %737 = vst.msk [vmem:[#allocation2 + $0x18] sm:$0xf] %vm303_vm12, %v729_v36  ;;  %738 = vst.msk [vmem:[#allocation2 + $0x28] sm:$0xf] %vm303_vm12, %v730_v38  ;;  %v892_v49 = vrot.slane %v870_v21, %v3259_v37  ;;  %v1065_v36 = vld [vmem:[#allocation2 + $0x10] sm:$0x3] }
 0x124   :  { %v899_v50 = vrot.slane %v871_v22, %v3259_v37  ;;  %741 = vst.msk [vmem:[#allocation2 + $0x58] sm:$0xf] %vm303_vm12, %v733_v40  ;;  %742 = vst.msk [vmem:[#allocation2 + $0x68] sm:$0xf] %vm303_vm12, %v734_v41  ;;  %v900_v54 = vcombine.high %v878_v43, %v878_v43  ;;  %v901_v55 = vcombine.high %v885_v44, %v885_v44 }
 0x125   :  { %v907_v56 = vrot.slane %v878_v43, %v3262_v42  ;;  %v923_v57 = vrot.slane %v885_v44, %v3262_v42  ;;  %v3341_v58 = vpop.f32.mrb[6].mxu1  ;;  %739 = vst.msk [vmem:[#allocation2 + $0x38] sm:$0xf] %vm303_vm12, %v731_v45  ;;  %743 = vst.msk [vmem:[#allocation2 + $0x78] sm:$0xf] %vm303_vm12, %v735_v46  ;;  %v902_v61 = vcombine.high %v892_v49, %v892_v49 }
 0x126   :  { %v903_v62 = vcombine.high %v899_v50, %v899_v50  ;;  %v911_v63 = vrot.slane %v892_v49, %v3262_v42  ;;  %v927_v2 = vrot.slane %v899_v50, %v3262_v42  ;;  %v915_v5 = vrot.slane %v900_v54, %v3262_v42  ;;  %v2820_v13 = vpop.f32.mrb[7].mxu1  ;;  %v1066_v43 = vld [vmem:[#allocation2 + $0x20] sm:$0x3]  ;;  %v1067_v50 = vld [vmem:[#allocation2 + $0x30] sm:$0x3] }
 0x127   :  { %v931_v6 = vrot.slane %v901_v55, %v3262_v42  ;;  %v944_v7 = vadd.f32 %v907_v56, %v846_v47  ;;  %v948_v8 = vadd.f32 %v923_v57, %v850_v48  ;;  %v919_v9 = vrot.slane %v902_v61, %v3262_v42  ;;  %v1068_v44 = vld [vmem:[#allocation2 + $0x40] sm:$0x3]  ;;  %v1283_v13 = vld [vmem:[#allocation2 + $0x22] sm:$0x3] }
 0x128   :  { %v935_v10 = vrot.slane %v903_v62, %v3262_v42  ;;  %v945_v11 = vadd.f32 %v911_v63, %v847_v51  ;;  %v949_v12 = vadd.f32 %v927_v2, %v851_v53  ;;  %v946_v14 = vadd.f32 %v915_v5, %v848_v59  ;;  %v1069_v51 = vld [vmem:[#allocation2 + $0x50] sm:$0x3]  ;;  %v1070_v53 = vld [vmem:[#allocation2 + $0x60] sm:$0x3] }
 0x129   :  { %v950_v16 = vadd.f32 %v931_v6, %v852_v60  ;;  %952 = vst.msk [vmem:[#allocation2 + $0xc] sm:$0xf] %vm303_vm12, %v944_v7  ;;  %956 = vst.msk [vmem:[#allocation2 + $0x4c] sm:$0xf] %vm303_vm12, %v948_v8  ;;  %v1073_v18 = vcombine.high %v3299_v52, %v3299_v52  ;;  %v1080_v19 = vrot.slane %v3299_v52, %v3259_v37  ;;  %v3357_v20 = vpop.f32.mrb[8].mxu0 }
 0x12a   :  { %v947_v21 = vadd.f32 %v919_v9, %v849_v3  ;;  %v951_v22 = vadd.f32 %v935_v10, %v853_v4  ;;  %953 = vst.msk [vmem:[#allocation2 + $0x1c] sm:$0xf] %vm303_vm12, %v945_v11  ;;  %957 = vst.msk [vmem:[#allocation2 + $0x5c] sm:$0xf] %vm303_vm12, %v949_v12  ;;  %v1290_v17 = vcombine.high %v3317_v15, %v3317_v15  ;;  %v2825_v35 = vpop.f32.mrb[9].mxu0 }
 0x12b   :  { %v1297_v0 = vrot.slane %v3317_v15, %v3259_v37  ;;  %954 = vst.msk [vmem:[#allocation2 + $0x2c] sm:$0xf] %vm303_vm12, %v946_v14  ;;  %958 = vst.msk [vmem:[#allocation2 + $0x6c] sm:$0xf] %vm303_vm12, %v950_v16  ;;  %v1087_v52 = vrot.slane %v1073_v18, %v3259_v37  ;;  %v1088_v23 = vcombine.high %v1080_v19, %v1080_v19  ;;  %v1071_v2 = vld [vmem:[#allocation2 + $0x70] sm:$0x3] }
 0x12c   :  { %v1096_v24 = vrot.slane %v1080_v19, %v3259_v37  ;;  %v1506_v25 = vcombine.high %v3325_v33, %v3325_v33  ;;  %955 = vst.msk [vmem:[#allocation2 + $0x3c] sm:$0xf] %vm303_vm12, %v947_v21  ;;  %959 = vst.msk [vmem:[#allocation2 + $0x7c] sm:$0xf] %vm303_vm12, %v951_v22  ;;  %v1304_v26 = vrot.slane %v1290_v17, %v3259_v37  ;;  %v1281_v11 = vld [vmem:[#allocation2 + $0x2] sm:$0x3] }
 0x12d   :  { %v1305_v27 = vcombine.high %v1297_v0, %v1297_v0  ;;  %v3375_v15 = vrot.slane %v1297_v0, %v3259_v37  ;;  %v3379_v28 = vrot.slane %v3325_v33, %v3259_v37  ;;  %v1089_v30 = vcombine.high %v1087_v52, %v1087_v52  ;;  %v3383_v34 = vpop.f32.mrb[8].mxu1  ;;  %v1282_v12 = vld [vmem:[#allocation2 + $0x12] sm:$0x3]  ;;  %v1285_v16 = vld [vmem:[#allocation2 + $0x42] sm:$0x3] }
 0x12e   :  { %v1103_v31 = vrot.slane %v1087_v52, %v3259_v37  ;;  %v1110_v1 = vrot.slane %v1088_v23, %v3259_v37  ;;  %v1118_v32 = vcombine.high %v1096_v24, %v1096_v24  ;;  %v1125_v38 = vrot.slane %v1096_v24, %v3262_v42  ;;  %v2830_v49 = vpop.f32.mrb[9].mxu1  ;;  %v1284_v14 = vld [vmem:[#allocation2 + $0x32] sm:$0x3]  ;;  %v1287_v52 = vld [vmem:[#allocation2 + $0x62] sm:$0x3] }
 0x12f   :  { %v1306_v39 = vcombine.high %v1304_v26, %v1304_v26  ;;  %v3387_v40 = vrot.slane %v1304_v26, %v3259_v37  ;;  %v1327_v41 = vrot.slane %v1305_v27, %v3259_v37  ;;  %v1117_v45 = vrot.slane %v1089_v30, %v3259_v37  ;;  %v1286_v18 = vld [vmem:[#allocation2 + $0x52] sm:$0x3] }
 0x130   :  { %v1119_v46 = vcombine.high %v1103_v31, %v1103_v31  ;;  %v1120_v47 = vcombine.high %v1110_v1, %v1110_v1  ;;  %v1129_v48 = vrot.slane %v1110_v1, %v3262_v42  ;;  %v1133_v54 = vrot.slane %v1118_v32, %v3262_v42  ;;  %v1288_v23 = vld [vmem:[#allocation2 + $0x72] sm:$0x3] }
 0x131   :  { %v1141_v55 = vrot.slane %v1103_v31, %v3262_v42  ;;  %v1162_v56 = vadd.f32 %v1125_v38, %v1064_v29  ;;  %v1334_v57 = vrot.slane %v1306_v39, %v3259_v37  ;;  %v1121_v59 = vcombine.high %v1117_v45, %v1117_v45  ;;  %v3398_v63 = vpop.f32.mrb[10].mxu0 }
 0x132   :  { %v1137_v60 = vrot.slane %v1120_v47, %v3262_v42  ;;  %v1145_v61 = vrot.slane %v1117_v45, %v3262_v42  ;;  %v1149_v62 = vrot.slane %v1119_v46, %v3262_v42  ;;  %v1163_v3 = vadd.f32 %v1129_v48, %v1065_v36  ;;  %v2835_v30 = vpop.f32.mrb[11].mxu0 }
 0x133   :  { %v1164_v4 = vadd.f32 %v1133_v54, %v1066_v43  ;;  %v1166_v5 = vadd.f32 %v1141_v55, %v1068_v44  ;;  %1171 = vst.msk [vmem:[#allocation2] sm:$0x3] %vm1170_vm13, %v1162_v56  ;;  %v1335_v6 = vcombine.high %v3375_v15, %v3375_v15  ;;  %v1153_v7 = vrot.slane %v1121_v59, %v3262_v42 }
 0x134   :  { %v1165_v8 = vadd.f32 %v1137_v60, %v1067_v50  ;;  %v1167_v9 = vadd.f32 %v1145_v61, %v1069_v51  ;;  %v1168_v10 = vadd.f32 %v1149_v62, %v1070_v53  ;;  %1172 = vst.msk [vmem:[#allocation2 + $0x10] sm:$0x3] %vm1170_vm13, %v1163_v3  ;;  %v1336_v19 = vcombine.high %v3387_v40, %v3387_v40  ;;  %v1497_v60 = vld [vmem:[#allocation2 + $0x4] sm:$0x3] }
 0x135   :  { %1173 = vst.msk [vmem:[#allocation2 + $0x20] sm:$0x3] %vm1170_vm13, %v1164_v4  ;;  %1175 = vst.msk [vmem:[#allocation2 + $0x40] sm:$0x3] %vm1170_vm13, %v1166_v5  ;;  %v1337_v21 = vcombine.high %v1327_v41, %v1327_v41  ;;  %v1338_v22 = vcombine.high %v1334_v57, %v1334_v57  ;;  %v1342_v17 = vrot.slane %v3375_v15, %v3262_v42  ;;  %v3418_v29 = vpop.f32.mrb[10].mxu1 }
 0x136   :  { %v1169_v0 = vadd.f32 %v1153_v7, %v1071_v2  ;;  %1174 = vst.msk [vmem:[#allocation2 + $0x30] sm:$0x3] %vm1170_vm13, %v1165_v8  ;;  %1176 = vst.msk [vmem:[#allocation2 + $0x50] sm:$0x3] %vm1170_vm13, %v1167_v9  ;;  %v1346_v24 = vrot.slane %v1327_v41, %v3262_v42  ;;  %v1350_v26 = vrot.slane %v1335_v6, %v3262_v42  ;;  %v2840_v35 = vpop.f32.mrb[11].mxu1 }
 0x137   :  { %1177 = vst.msk [vmem:[#allocation2 + $0x60] sm:$0x3] %vm1170_vm13, %v1168_v10  ;;  %v1358_v27 = vrot.slane %v3387_v40, %v3262_v42  ;;  %v1354_v15 = vrot.slane %v1337_v21, %v3262_v42  ;;  %v1362_v31 = vrot.slane %v1334_v57, %v3262_v42  ;;  %v1366_v1 = vrot.slane %v1336_v19, %v3262_v42  ;;  %v1498_v7 = vld [vmem:[#allocation2 + $0x14] sm:$0x3]  ;;  %v1499_v8 = vld [vmem:[#allocation2 + $0x24] sm:$0x3] }
 0x138   :  { %v1370_v32 = vrot.slane %v1338_v22, %v3262_v42  ;;  %1178 = vst.msk [vmem:[#allocation2 + $0x70] sm:$0x3] %vm1170_vm13, %v1169_v0  ;;  %v1379_v36 = vadd.f32 %v1342_v17, %v1281_v11  ;;  %v1380_v38 = vadd.f32 %v1346_v24, %v1282_v12  ;;  %v1381_v39 = vadd.f32 %v1350_v26, %v1283_v13  ;;  %v1501_v9 = vld [vmem:[#allocation2 + $0x44] sm:$0x3]  ;;  %v1504_v26 = vld [vmem:[#allocation2 + $0x74] sm:$0x3] }
 0x139   :  { %v1383_v41 = vadd.f32 %v1358_v27, %v1285_v16  ;;  %v1382_v43 = vadd.f32 %v1354_v15, %v1284_v14  ;;  %v1384_v40 = vadd.f32 %v1362_v31, %v1286_v18  ;;  %v1385_v44 = vadd.f32 %v1366_v1, %v1287_v52  ;;  %v1500_v14 = vld [vmem:[#allocation2 + $0x34] sm:$0x3]  ;;  %v1503_v18 = vld [vmem:[#allocation2 + $0x64] sm:$0x3] }
 0x13a   :  { %v1386_v45 = vadd.f32 %v1370_v32, %v1288_v23  ;;  %1387 = vst.msk [vmem:[#allocation2 + $0x2] sm:$0x3] %vm1170_vm13, %v1379_v36  ;;  %1388 = vst.msk [vmem:[#allocation2 + $0x12] sm:$0x3] %vm1170_vm13, %v1380_v38  ;;  %v1520_v46 = vrot.slane %v1506_v25, %v3259_v37  ;;  %v1521_v47 = vcombine.high %v3379_v28, %v3379_v28  ;;  %v1502_v16 = vld [vmem:[#allocation2 + $0x54] sm:$0x3] }
 0x13b   :  { %1389 = vst.msk [vmem:[#allocation2 + $0x22] sm:$0x3] %vm1170_vm13, %v1381_v39  ;;  %1391 = vst.msk [vmem:[#allocation2 + $0x42] sm:$0x3] %vm1170_vm13, %v1383_v41  ;;  %v1529_v48 = vrot.slane %v3379_v28, %v3259_v37  ;;  %v1722_v49 = vcombine.high %v3341_v58, %v3341_v58  ;;  %v1729_v33 = vrot.slane %v3341_v58, %v3259_v37  ;;  %v1713_v38 = vld [vmem:[#allocation2 + $0x6] sm:$0x3] }
 0x13c   :  { %1390 = vst.msk [vmem:[#allocation2 + $0x32] sm:$0x3] %vm1170_vm13, %v1382_v43  ;;  %1392 = vst.msk [vmem:[#allocation2 + $0x52] sm:$0x3] %vm1170_vm13, %v1384_v40  ;;  %v1938_v25 = vcombine.high %v3357_v20, %v3357_v20  ;;  %v3449_v28 = vrot.slane %v3357_v20, %v3259_v37  ;;  %v2154_v50 = vcombine.high %v3383_v34, %v3383_v34  ;;  %v1717_v39 = vld [vmem:[#allocation2 + $0x46] sm:$0x3] }
 0x13d   :  { %1393 = vst.msk [vmem:[#allocation2 + $0x62] sm:$0x3] %vm1170_vm13, %v1385_v44  ;;  %1394 = vst.msk [vmem:[#allocation2 + $0x72] sm:$0x3] %vm1170_vm13, %v1386_v45  ;;  %v1522_v51 = vcombine.high %v1520_v46, %v1520_v46  ;;  %v1536_v53 = vrot.slane %v1520_v46, %v3259_v37  ;;  %v1543_v54 = vrot.slane %v1521_v47, %v3259_v37  ;;  %v1714_v45 = vld [vmem:[#allocation2 + $0x16] sm:$0x3] }
 0x13e   :  { %v1551_v55 = vcombine.high %v1529_v48, %v1529_v48  ;;  %v1558_v56 = vrot.slane %v1529_v48, %v3262_v42  ;;  %v1736_v58 = vrot.slane %v1722_v49, %v3259_v37  ;;  %v1737_v57 = vcombine.high %v1729_v33, %v1729_v33  ;;  %v1715_v46 = vld [vmem:[#allocation2 + $0x26] sm:$0x3] }
 0x13f   :  { %v1745_v59 = vrot.slane %v1729_v33, %v3259_v37  ;;  %v1550_v20 = vrot.slane %v1522_v51, %v3259_v37  ;;  %v1552_v61 = vcombine.high %v1536_v53, %v1536_v53  ;;  %v1553_v62 = vcombine.high %v1543_v54, %v1543_v54  ;;  %v1718_v51 = vld [vmem:[#allocation2 + $0x56] sm:$0x3] }
 0x140   :  { %v1562_v2 = vrot.slane %v1543_v54, %v3262_v42  ;;  %v1566_v3 = vrot.slane %v1551_v55, %v3262_v42  ;;  %v1574_v4 = vrot.slane %v1536_v53, %v3262_v42  ;;  %v1595_v5 = vadd.f32 %v1558_v56, %v1497_v60 }
 0x141   :  { %v1738_v6 = vcombine.high %v1736_v58, %v1736_v58  ;;  %v1554_v10 = vcombine.high %v1550_v20, %v1550_v20  ;;  %v1570_v11 = vrot.slane %v1553_v62, %v3262_v42  ;;  %v1578_v12 = vrot.slane %v1550_v20, %v3262_v42 }
 0x142   :  { %v1582_v13 = vrot.slane %v1552_v61, %v3262_v42  ;;  %v1596_v19 = vadd.f32 %v1562_v2, %v1498_v7  ;;  %v1597_v21 = vadd.f32 %v1566_v3, %v1499_v8  ;;  %v1599_v22 = vadd.f32 %v1574_v4, %v1501_v9  ;;  %1603 = vst.msk [vmem:[#allocation2 + $0x4] sm:$0x3] %vm1170_vm13, %v1595_v5 }
 0x143   :  { %v1752_v17 = vrot.slane %v1736_v58, %v3259_v37  ;;  %v1586_v0 = vrot.slane %v1554_v10, %v3262_v42  ;;  %v1598_v52 = vadd.f32 %v1570_v11, %v1500_v14  ;;  %v1600_v23 = vadd.f32 %v1578_v12, %v1502_v16  ;;  %v1716_v58 = vld [vmem:[#allocation2 + $0x36] sm:$0x3]  ;;  %v1929_v12 = vld [vmem:[#allocation2 + $0x8] sm:$0x3] }
 0x144   :  { %v1601_v24 = vadd.f32 %v1582_v13, %v1503_v18  ;;  %1604 = vst.msk [vmem:[#allocation2 + $0x14] sm:$0x3] %vm1170_vm13, %v1596_v19  ;;  %1605 = vst.msk [vmem:[#allocation2 + $0x24] sm:$0x3] %vm1170_vm13, %v1597_v21  ;;  %v1759_v27 = vrot.slane %v1737_v57, %v3259_v37  ;;  %v1766_v30 = vrot.slane %v1738_v6, %v3259_v37  ;;  %v1720_v57 = vld [vmem:[#allocation2 + $0x76] sm:$0x3] }
 0x145   :  { %1607 = vst.msk [vmem:[#allocation2 + $0x44] sm:$0x3] %vm1170_vm13, %v1599_v22  ;;  %v1767_v15 = vcombine.high %v1745_v59, %v1745_v59  ;;  %v1768_v31 = vcombine.high %v1752_v17, %v1752_v17  ;;  %v1602_v1 = vadd.f32 %v1586_v0, %v1504_v26  ;;  %1606 = vst.msk [vmem:[#allocation2 + $0x34] sm:$0x3] %vm1170_vm13, %v1598_v52  ;;  %v1933_v13 = vld [vmem:[#allocation2 + $0x48] sm:$0x3] }
 0x146   :  { %1608 = vst.msk [vmem:[#allocation2 + $0x54] sm:$0x3] %vm1170_vm13, %v1600_v23  ;;  %1609 = vst.msk [vmem:[#allocation2 + $0x64] sm:$0x3] %vm1170_vm13, %v1601_v24  ;;  %v1774_v32 = vrot.slane %v1745_v59, %v3262_v42  ;;  %v1790_v35 = vrot.slane %v1752_v17, %v3262_v42  ;;  %v1952_v36 = vrot.slane %v1938_v25, %v3259_v37  ;;  %v1719_v25 = vld [vmem:[#allocation2 + $0x66] sm:$0x3] }
 0x147   :  { %v1769_v41 = vcombine.high %v1759_v27, %v1759_v27  ;;  %v1770_v43 = vcombine.high %v1766_v30, %v1766_v30  ;;  %v1778_v40 = vrot.slane %v1759_v27, %v3262_v42  ;;  %v1782_v44 = vrot.slane %v1767_v15, %v3262_v42  ;;  %1610 = vst.msk [vmem:[#allocation2 + $0x74] sm:$0x3] %vm1170_vm13, %v1602_v1  ;;  %v1931_v52 = vld [vmem:[#allocation2 + $0x28] sm:$0x3]  ;;  %v1932_v23 = vld [vmem:[#allocation2 + $0x38] sm:$0x3] }
 0x148   :  { %v1794_v47 = vrot.slane %v1766_v30, %v3262_v42  ;;  %v1798_v48 = vrot.slane %v1768_v31, %v3262_v42  ;;  %v1811_v49 = vadd.f32 %v1774_v32, %v1713_v38  ;;  %v1815_v33 = vadd.f32 %v1790_v35, %v1717_v39  ;;  %v1935_v24 = vld [vmem:[#allocation2 + $0x68] sm:$0x3]  ;;  %v1936_v32 = vld [vmem:[#allocation2 + $0x78] sm:$0x3] }
 0x149   :  { %v1786_v53 = vrot.slane %v1769_v41, %v3262_v42  ;;  %v1802_v54 = vrot.slane %v1770_v43, %v3262_v42  ;;  %v1812_v55 = vadd.f32 %v1778_v40, %v1714_v45  ;;  %v1813_v56 = vadd.f32 %v1782_v44, %v1715_v46 }
 0x14a   :  { %v1816_v59 = vadd.f32 %v1794_v47, %v1718_v51  ;;  %v1817_v60 = vadd.f32 %v1798_v48, %v1719_v25  ;;  %1819 = vst.msk [vmem:[#allocation2 + $0x6] sm:$0x3] %vm1170_vm13, %v1811_v49  ;;  %1823 = vst.msk [vmem:[#allocation2 + $0x46] sm:$0x3] %vm1170_vm13, %v1815_v33  ;;  %v1953_v20 = vcombine.high %v3449_v28, %v3449_v28 }
 0x14b   :  { %v1954_v61 = vcombine.high %v1952_v36, %v1952_v36  ;;  %v1814_v62 = vadd.f32 %v1786_v53, %v1716_v58  ;;  %v1818_v2 = vadd.f32 %v1802_v54, %v1720_v57  ;;  %1820 = vst.msk [vmem:[#allocation2 + $0x16] sm:$0x3] %vm1170_vm13, %v1812_v55  ;;  %1821 = vst.msk [vmem:[#allocation2 + $0x26] sm:$0x3] %vm1170_vm13, %v1813_v56 }
 0x14c   :  { %v1961_v3 = vrot.slane %v3449_v28, %v3259_v37  ;;  %v1968_v4 = vrot.slane %v1952_v36, %v3259_v37  ;;  %1824 = vst.msk [vmem:[#allocation2 + $0x56] sm:$0x3] %vm1170_vm13, %v1816_v59  ;;  %1825 = vst.msk [vmem:[#allocation2 + $0x66] sm:$0x3] %vm1170_vm13, %v1817_v60  ;;  %v1975_v5 = vrot.slane %v1953_v20, %v3259_v37  ;;  %v2149_v59 = vld [vmem:[#allocation2 + $0x4a] sm:$0x3] }
 0x14d   :  { %v1982_v6 = vrot.slane %v1954_v61, %v3259_v37  ;;  %v2161_v7 = vrot.slane %v3383_v34, %v3259_v37  ;;  %v2168_v8 = vrot.slane %v2154_v50, %v3259_v37  ;;  %1822 = vst.msk [vmem:[#allocation2 + $0x36] sm:$0x3] %vm1170_vm13, %v1814_v62  ;;  %1826 = vst.msk [vmem:[#allocation2 + $0x76] sm:$0x3] %vm1170_vm13, %v1818_v2  ;;  %v1930_v34 = vld [vmem:[#allocation2 + $0x18] sm:$0x3] }
 0x14e   :  { %v1983_v28 = vcombine.high %v1961_v3, %v1961_v3  ;;  %v1984_v9 = vcombine.high %v1968_v4, %v1968_v4  ;;  %v1990_v10 = vrot.slane %v1961_v3, %v3262_v42  ;;  %v2006_v11 = vrot.slane %v1968_v4, %v3262_v42  ;;  %v1934_v50 = vld [vmem:[#allocation2 + $0x58] sm:$0x3]  ;;  %v2146_v2 = vld [vmem:[#allocation2 + $0x1a] sm:$0x3] }
 0x14f   :  { %v1985_v14 = vcombine.high %v1975_v5, %v1975_v5  ;;  %v1986_v16 = vcombine.high %v1982_v6, %v1982_v6  ;;  %v1994_v18 = vrot.slane %v1975_v5, %v3262_v42  ;;  %v2010_v19 = vrot.slane %v1982_v6, %v3262_v42  ;;  %v2150_v3 = vld [vmem:[#allocation2 + $0x5a] sm:$0x3] }
 0x150   :  { %v1998_v21 = vrot.slane %v1983_v28, %v3262_v42  ;;  %v2014_v22 = vrot.slane %v1984_v9, %v3262_v42  ;;  %v2027_v17 = vadd.f32 %v1990_v10, %v1929_v12  ;;  %v2031_v0 = vadd.f32 %v2006_v11, %v1933_v13  ;;  %v2151_v28 = vld [vmem:[#allocation2 + $0x6a] sm:$0x3]  ;;  %v2148_v13 = vld [vmem:[#allocation2 + $0x3a] sm:$0x3] }
 0x151   :  { %v2002_v26 = vrot.slane %v1985_v14, %v3262_v42  ;;  %v2018_v27 = vrot.slane %v1986_v16, %v3262_v42  ;;  %v2028_v30 = vadd.f32 %v1994_v18, %v1930_v34  ;;  %v2032_v15 = vadd.f32 %v2010_v19, %v1934_v50  ;;  %v2691_v31 = vld [vmem:[#allocation2] sm:$0xff]  ;;  %v2152_v14 = vld [vmem:[#allocation2 + $0x7a] sm:$0x3] }
 0x152   :  { %v2699_v1 = vld [vmem:[#allocation2 + $0x40] sm:$0xff]  ;;  %v2029_v35 = vadd.f32 %v1998_v21, %v1931_v52  ;;  %v2033_v36 = vadd.f32 %v2014_v22, %v1935_v24  ;;  %2035 = vst.msk [vmem:[#allocation2 + $0x8] sm:$0x3] %vm1170_vm13, %v2027_v17  ;;  %2039 = vst.msk [vmem:[#allocation2 + $0x48] sm:$0x3] %vm1170_vm13, %v2031_v0  ;;  %v2169_v38 = vcombine.high %v2161_v7, %v2161_v7  ;;  %v2693_v41 = vld [vmem:[#allocation2 + $0x10] sm:$0xff] }
 0x153   :  { %v2170_v39 = vcombine.high %v2168_v8, %v2168_v8  ;;  %v2695_v43 = vld [vmem:[#allocation2 + $0x20] sm:$0xff]  ;;  %2707 = vst.msk [vmem:[#allocation8] sm:$0xff] %vm65_vm10, %v2691_v31  ;;  %2715 = vst.msk [vmem:[#allocation8 + $0x40] sm:$0xff] %vm65_vm10, %v2699_v1  ;;  %v2030_v40 = vadd.f32 %v2002_v26, %v1932_v23  ;;  %v2034_v44 = vadd.f32 %v2018_v27, %v1936_v32  ;;  %v2701_v47 = vld [vmem:[#allocation2 + $0x50] sm:$0xff] }
 0x154   :  { %2036 = vst.msk [vmem:[#allocation2 + $0x18] sm:$0x3] %vm1170_vm13, %v2028_v30  ;;  %2040 = vst.msk [vmem:[#allocation2 + $0x58] sm:$0x3] %vm1170_vm13, %v2032_v15  ;;  %v2177_v45 = vrot.slane %v2161_v7, %v3259_v37  ;;  %v2184_v46 = vrot.slane %v2168_v8, %v3259_v37  ;;  %v2703_v48 = vld [vmem:[#allocation2 + $0x60] sm:$0xff]  ;;  %v2191_v49 = vrot.slane %v2169_v38, %v3259_v37  ;;  %v2697_v53 = vld [vmem:[#allocation2 + $0x30] sm:$0xff] }
 0x155   :  { %2709 = vst.msk [vmem:[#allocation8 + $0x10] sm:$0xff] %vm65_vm10, %v2693_v41  ;;  %2711 = vst.msk [vmem:[#allocation8 + $0x20] sm:$0xff] %vm65_vm10, %v2695_v43  ;;  %v2198_v33 = vrot.slane %v2170_v39, %v3259_v37  ;;  %v2370_v51 = vcombine.high %v3398_v63, %v3398_v63  ;;  %v2377_v25 = vrot.slane %v3398_v63, %v3259_v37  ;;  %v2705_v54 = vld [vmem:[#allocation2 + $0x70] sm:$0xff]  ;;  %v2145_v63 = vld [vmem:[#allocation2 + $0xa] sm:$0x3] }
 0x156   :  { %2037 = vst.msk [vmem:[#allocation2 + $0x28] sm:$0x3] %vm1170_vm13, %v2029_v35  ;;  %2041 = vst.msk [vmem:[#allocation2 + $0x68] sm:$0x3] %vm1170_vm13, %v2033_v36  ;;  %v2199_v55 = vcombine.high %v2177_v45, %v2177_v45  ;;  %v2200_v56 = vcombine.high %v2184_v46, %v2184_v46  ;;  %v2206_v58 = vrot.slane %v2177_v45, %v3262_v42  ;;  %v2147_v8 = vld [vmem:[#allocation2 + $0x2a] sm:$0x3] }
 0x157   :  { %2717 = vst.msk [vmem:[#allocation8 + $0x50] sm:$0xff] %vm65_vm10, %v2701_v47  ;;  %2719 = vst.msk [vmem:[#allocation8 + $0x60] sm:$0xff] %vm65_vm10, %v2703_v48  ;;  %v2222_v57 = vrot.slane %v2184_v46, %v3262_v42  ;;  %v2201_v60 = vcombine.high %v2191_v49, %v2191_v49  ;;  %v2202_v20 = vcombine.high %v2198_v33, %v2198_v33  ;;  %v2361_v15 = vld [vmem:[#allocation2 + $0xc] sm:$0x3]  ;;  %v2362_v41 = vld [vmem:[#allocation2 + $0x1c] sm:$0x3] }
 0x158   :  { %2038 = vst.msk [vmem:[#allocation2 + $0x38] sm:$0x3] %vm1170_vm13, %v2030_v40  ;;  %2042 = vst.msk [vmem:[#allocation2 + $0x78] sm:$0x3] %vm1170_vm13, %v2034_v44  ;;  %v2210_v61 = vrot.slane %v2191_v49, %v3262_v42  ;;  %v2226_v62 = vrot.slane %v2198_v33, %v3262_v42  ;;  %v2214_v4 = vrot.slane %v2199_v55, %v3262_v42  ;;  %v2363_v43 = vld [vmem:[#allocation2 + $0x2c] sm:$0x3] }
 0x159   :  { %2713 = vst.msk [vmem:[#allocation8 + $0x30] sm:$0xff] %vm65_vm10, %v2697_v53  ;;  %2721 = vst.msk [vmem:[#allocation8 + $0x70] sm:$0xff] %vm65_vm10, %v2705_v54  ;;  %v2230_v5 = vrot.slane %v2200_v56, %v3262_v42  ;;  %v2243_v6 = vadd.f32 %v2206_v58, %v2145_v63  ;;  %v2247_v7 = vadd.f32 %v2222_v57, %v2149_v59  ;;  %v2365_v40 = vld [vmem:[#allocation2 + $0x4c] sm:$0x3]  ;;  %v2364_v48 = vld [vmem:[#allocation2 + $0x3c] sm:$0x3] }
 0x15a   :  { %v2218_v9 = vrot.slane %v2201_v60, %v3262_v42  ;;  %v2234_v10 = vrot.slane %v2202_v20, %v3262_v42  ;;  %v2244_v11 = vadd.f32 %v2210_v61, %v2146_v2  ;;  %v2248_v12 = vadd.f32 %v2226_v62, %v2150_v3  ;;  %v2366_v49 = vld [vmem:[#allocation2 + $0x5c] sm:$0x3]  ;;  %v2367_v33 = vld [vmem:[#allocation2 + $0x6c] sm:$0x3] }
 0x15b   :  { %v2245_v16 = vadd.f32 %v2214_v4, %v2147_v8  ;;  %v2249_v18 = vadd.f32 %v2230_v5, %v2151_v28  ;;  %2251 = vst.msk [vmem:[#allocation2 + $0xa] sm:$0x3] %vm1170_vm13, %v2243_v6  ;;  %2255 = vst.msk [vmem:[#allocation2 + $0x4a] sm:$0x3] %vm1170_vm13, %v2247_v7  ;;  %v2384_v19 = vrot.slane %v2370_v51, %v3259_v37  ;;  %v2368_v63 = vld [vmem:[#allocation2 + $0x7c] sm:$0x3] }
 0x15c   :  { %v2385_v34 = vcombine.high %v2377_v25, %v2377_v25  ;;  %v2246_v50 = vadd.f32 %v2218_v9, %v2148_v13  ;;  %v2250_v21 = vadd.f32 %v2234_v10, %v2152_v14  ;;  %2252 = vst.msk [vmem:[#allocation2 + $0x1a] sm:$0x3] %vm1170_vm13, %v2244_v11  ;;  %2256 = vst.msk [vmem:[#allocation2 + $0x5a] sm:$0x3] %vm1170_vm13, %v2248_v12  ;;  %v2577_v6 = vld [vmem:[#allocation2 + $0xe] sm:$0x3] }
 0x15d   :  { %v2393_v22 = vrot.slane %v2377_v25, %v3259_v37  ;;  %v2586_v17 = vcombine.high %v3418_v29, %v3418_v29  ;;  %2253 = vst.msk [vmem:[#allocation2 + $0x2a] sm:$0x3] %vm1170_vm13, %v2245_v16  ;;  %2257 = vst.msk [vmem:[#allocation2 + $0x6a] sm:$0x3] %vm1170_vm13, %v2249_v18  ;;  %v2386_v0 = vcombine.high %v2384_v19, %v2384_v19  ;;  %v2578_v7 = vld [vmem:[#allocation2 + $0x1e] sm:$0x3] }
 0x15e   :  { %v2400_v52 = vrot.slane %v2384_v19, %v3259_v37  ;;  %v2407_v23 = vrot.slane %v2385_v34, %v3259_v37  ;;  %v2593_v24 = vrot.slane %v3418_v29, %v3259_v37  ;;  %2254 = vst.msk [vmem:[#allocation2 + $0x3a] sm:$0x3] %vm1170_vm13, %v2246_v50  ;;  %2258 = vst.msk [vmem:[#allocation2 + $0x7a] sm:$0x3] %vm1170_vm13, %v2250_v21  ;;  %v2579_v10 = vld [vmem:[#allocation2 + $0x2e] sm:$0x3] }
 0x15f   :  { %v2415_v26 = vcombine.high %v2393_v22, %v2393_v22  ;;  %v2422_v27 = vrot.slane %v2393_v22, %v3262_v42  ;;  %v2600_v30 = vrot.slane %v2586_v17, %v3259_v37  ;;  %v2414_v31 = vrot.slane %v2386_v0, %v3259_v37  ;;  %v2581_v11 = vld [vmem:[#allocation2 + $0x4e] sm:$0x3]  ;;  %v2582_v12 = vld [vmem:[#allocation2 + $0x5e] sm:$0x3] }
 0x160   :  { %v2416_v1 = vcombine.high %v2400_v52, %v2400_v52  ;;  %v2417_v32 = vcombine.high %v2407_v23, %v2407_v23  ;;  %v2426_v35 = vrot.slane %v2407_v23, %v3262_v42  ;;  %v2438_v29 = vrot.slane %v2400_v52, %v3262_v42  ;;  %v2580_v19 = vld [vmem:[#allocation2 + $0x3e] sm:$0x3]  ;;  %v2583_v34 = vld [vmem:[#allocation2 + $0x6e] sm:$0x3] }
 0x161   :  { %v2430_v36 = vrot.slane %v2415_v26, %v3262_v42  ;;  %v2459_v38 = vadd.f32 %v2422_v27, %v2361_v15  ;;  %v2601_v39 = vcombine.high %v2593_v24, %v2593_v24  ;;  %v2418_v44 = vcombine.high %v2414_v31, %v2414_v31  ;;  %v2584_v50 = vld [vmem:[#allocation2 + $0x7e] sm:$0x3] }
 0x162   :  { %v2434_v45 = vrot.slane %v2417_v32, %v3262_v42  ;;  %v2442_v46 = vrot.slane %v2414_v31, %v3262_v42  ;;  %v2446_v47 = vrot.slane %v2416_v1, %v3262_v42  ;;  %v2460_v51 = vadd.f32 %v2426_v35, %v2362_v41 }
 0x163   :  { %v2461_v25 = vadd.f32 %v2430_v36, %v2363_v43  ;;  %v2463_v53 = vadd.f32 %v2438_v29, %v2365_v40  ;;  %2467 = vst.msk [vmem:[#allocation2 + $0xc] sm:$0x3] %vm1170_vm13, %v2459_v38  ;;  %v2602_v54 = vcombine.high %v2600_v30, %v2600_v30  ;;  %v2450_v55 = vrot.slane %v2418_v44, %v3262_v42 }
 0x164   :  { %v2462_v56 = vadd.f32 %v2434_v45, %v2364_v48  ;;  %v2464_v58 = vadd.f32 %v2442_v46, %v2366_v49  ;;  %v2465_v57 = vadd.f32 %v2446_v47, %v2367_v33  ;;  %2468 = vst.msk [vmem:[#allocation2 + $0x1c] sm:$0x3] %vm1170_vm13, %v2460_v51  ;;  %v2609_v59 = vrot.slane %v2593_v24, %v3259_v37 }
 0x165   :  { %2469 = vst.msk [vmem:[#allocation2 + $0x2c] sm:$0x3] %vm1170_vm13, %v2461_v25  ;;  %2471 = vst.msk [vmem:[#allocation2 + $0x4c] sm:$0x3] %vm1170_vm13, %v2463_v53  ;;  %v2616_v60 = vrot.slane %v2600_v30, %v3259_v37  ;;  %v2623_v20 = vrot.slane %v2601_v39, %v3259_v37  ;;  %v2630_v61 = vrot.slane %v2602_v54, %v3259_v37 }
 0x166   :  { %v2466_v62 = vadd.f32 %v2450_v55, %v2368_v63  ;;  %2470 = vst.msk [vmem:[#allocation2 + $0x3c] sm:$0x3] %vm1170_vm13, %v2462_v56  ;;  %2472 = vst.msk [vmem:[#allocation2 + $0x5c] sm:$0x3] %vm1170_vm13, %v2464_v58  ;;  %v2631_v2 = vcombine.high %v2609_v59, %v2609_v59  ;;  %v2638_v8 = vrot.slane %v2609_v59, %v3262_v42 }
 0x167   :  { %2473 = vst.msk [vmem:[#allocation2 + $0x6c] sm:$0x3] %vm1170_vm13, %v2465_v57  ;;  %v2632_v3 = vcombine.high %v2616_v60, %v2616_v60  ;;  %v2633_v4 = vcombine.high %v2623_v20, %v2623_v20  ;;  %v2634_v5 = vcombine.high %v2630_v61, %v2630_v61  ;;  %v2642_v28 = vrot.slane %v2623_v20, %v3262_v42 }
 0x168   :  { %2474 = vst.msk [vmem:[#allocation2 + $0x7c] sm:$0x3] %vm1170_vm13, %v2466_v62  ;;  %v2654_v37 = vrot.slane %v2616_v60, %v3262_v42  ;;  %v2658_v9 = vrot.slane %v2630_v61, %v3262_v42  ;;  %v2646_v13 = vrot.slane %v2631_v2, %v3262_v42  ;;  %v2675_v21 = vadd.f32 %v2638_v8, %v2577_v6 }
 0x169   :  { %v2650_v14 = vrot.slane %v2633_v4, %v3262_v42  ;;  %v2662_v16 = vrot.slane %v2632_v3, %v3262_v42  ;;  %v2666_v18 = vrot.slane %v2634_v5, %v3262_v42  ;;  %v2676_v22 = vadd.f32 %v2642_v28, %v2578_v7 }
 0x16a   :  { %v2679_v17 = vadd.f32 %v2654_v37, %v2581_v11  ;;  %v2680_v0 = vadd.f32 %v2658_v9, %v2582_v12  ;;  %v2677_v52 = vadd.f32 %v2646_v13, %v2579_v10  ;;  %2683 = vst.msk [vmem:[#allocation2 + $0xe] sm:$0x3] %vm1170_vm13, %v2675_v21 }
 0x16b   :  { %v2678_v23 = vadd.f32 %v2650_v14, %v2580_v19  ;;  %v2681_v24 = vadd.f32 %v2662_v16, %v2583_v34  ;;  %v2682_v26 = vadd.f32 %v2666_v18, %v2584_v50  ;;  %2684 = vst.msk [vmem:[#allocation2 + $0x1e] sm:$0x3] %vm1170_vm13, %v2676_v22 }
 0x16c   :  { %2687 = vst.msk [vmem:[#allocation2 + $0x4e] sm:$0x3] %vm1170_vm13, %v2679_v17  ;;  %2688 = vst.msk [vmem:[#allocation2 + $0x5e] sm:$0x3] %vm1170_vm13, %v2680_v0 }
 0x16d   :  { %2685 = vst.msk [vmem:[#allocation2 + $0x2e] sm:$0x3] %vm1170_vm13, %v2677_v52  ;;  %2686 = vst.msk [vmem:[#allocation2 + $0x3e] sm:$0x3] %vm1170_vm13, %v2678_v23 }
 0x16e   :  { %2689 = vst.msk [vmem:[#allocation2 + $0x6e] sm:$0x3] %vm1170_vm13, %v2681_v24  ;;  %2690 = vst.msk [vmem:[#allocation2 + $0x7e] sm:$0x3] %vm1170_vm13, %v2682_v26 }
 0x171   :  { %v2692_v42 = vld [vmem:[#allocation2 + $0x8] sm:$0xff] }
 0x172   :  { %v2694_v27 = vld [vmem:[#allocation2 + $0x18] sm:$0xff]  ;;  %2708 = vst.msk [vmem:[#allocation8 + $0x8] sm:$0xff] %vm65_vm10, %v2692_v42 }
 0x173   :  { %v2700_v30 = vld [vmem:[#allocation2 + $0x48] sm:$0xff]  ;;  %v2702_v1 = vld [vmem:[#allocation2 + $0x58] sm:$0xff]  ;;  %2710 = vst.msk [vmem:[#allocation8 + $0x18] sm:$0xff] %vm65_vm10, %v2694_v27 }
 0x174   :  { %v2696_v15 = vld [vmem:[#allocation2 + $0x28] sm:$0xff]  ;;  %v2698_v31 = vld [vmem:[#allocation2 + $0x38] sm:$0xff]  ;;  %2716 = vst.msk [vmem:[#allocation8 + $0x48] sm:$0xff] %vm65_vm10, %v2700_v30  ;;  %2718 = vst.msk [vmem:[#allocation8 + $0x58] sm:$0xff] %vm65_vm10, %v2702_v1 }
 0x175   :  { %v2704_v32 = vld [vmem:[#allocation2 + $0x68] sm:$0xff]  ;;  %v2706_v35 = vld [vmem:[#allocation2 + $0x78] sm:$0xff]  ;;  %2712 = vst.msk [vmem:[#allocation8 + $0x28] sm:$0xff] %vm65_vm10, %v2696_v15  ;;  %2714 = vst.msk [vmem:[#allocation8 + $0x38] sm:$0xff] %vm65_vm10, %v2698_v31 }
 0x176   :  { %2720 = vst.msk [vmem:[#allocation8 + $0x68] sm:$0xff] %vm65_vm10, %v2704_v32  ;;  %2722 = vst.msk [vmem:[#allocation8 + $0x78] sm:$0xff] %vm65_vm10, %v2706_v35 }
 0x177   :  { %2904 = shalt.err (!%p2901_p6)
}
 0x178   :  { %s2905_s12 = scalar_lea.hbm %s3629_s5, 2048 }
 0x179   :  { %p2906_p7 = scmp.ne.s32.totalorder %s3629_s5, %s2905_s12  ;;  %p2909_p8 = scmp.lt.u32.totalorder %s2905_s12, %s3629_s5 }
 0x17b   :  { %p2911_p9 = pnand %p2909_p8, %p2906_p7 }
 0x17d   :  { %2914 = shalt.err (!%p2911_p9)
}
 0x17e   :  { %2734 = dma.vmem_to_hbm [thread:$0]  %s2729_s3, 2048, %s3629_s5, [#allocation5], %s2922_s28, %s2922_s28, %s2923_s29  }
 0x17f   :  { %2919 = dma.done.wait [#allocation5], 2048  }
 0x180   :  { %2920 = vsyncadd [#allocation5], 4294965248 }
 0x181   :  { %2738 = vsyncpa [#allocation4], 1 }
 0x182   :  { %2739 = vsyncpa [#allocation7], 1 }
 0x183   :  { %2740 = vsyncpa [#allocation5], 1 }

</bundles_post_ra>
